<compile_context>
chip_gen: v6e
topology: v6e:2x2x1
jax: 0.10.0
libtpu: 0.0.40
codegen_flags: <defaults>
</compile_context>

<pallas_src>
import jax
import jax.numpy as jnp
from jax.experimental import pallas as pl
from jax.experimental.pallas import tpu as pltpu


# ----------------------------------------------------------------------------
# small helpers
# ----------------------------------------------------------------------------
def _pick_cblock(c):
    """Channel (lane) block: full if small, else a 128-multiple divisor."""
    if c <= 256:
        return c
    for t in (256, 128):
        if c % t == 0:
            return t
    return c


def _pick_tm(m):
    """Row block for the plain matmul: full if small, else an 8-mult divisor."""
    if m <= 512:
        return m
    for t in (512, 256, 128, 64, 32, 16, 8):
        if m % t == 0:
            return t
    return m


_VMEM_LIMIT = 32 * 1024 * 1024  # safe on v5e/v6e (128 MiB) and v7x (64 MiB)


# ----------------------------------------------------------------------------
# 3x3 valid conv (+ bias + BN partial stats), whole image per grid step
# ----------------------------------------------------------------------------
def _make_conv3x3_kernel(n_in, w, ho, wo):
    """refs: n_in x (1, H*W, Cin_i) bf16, n_in w (3,3,Cin_i,TN) bf16,
             b (1,TN) f32, y (1, Ho*W, TN) bf16, stats (1,2,TN) f32,
             scratch acc (Ho*W + 8, TN) f32."""
    m = ho * w
    pow2 = (w & (w - 1)) == 0

    def kernel(*refs):
        x_refs = refs[:n_in]
        w_refs = refs[n_in:2 * n_in]
        b_ref = refs[2 * n_in]
        o_ref = refs[2 * n_in + 1]
        s_ref = refs[2 * n_in + 2]
        acc_ref = refs[2 * n_in + 3]

        acc_ref[...] = jnp.zeros_like(acc_ref)
        for x_ref, w_ref in zip(x_refs, w_refs):
            # three contiguous row slabs (hoisted out of the tap loop)
            slabs = [x_ref[0, di * w: di * w + m, :] for di in range(3)]
            for dj in range(3):
                p = jnp.dot(slabs[0], w_ref[0, dj],
                            preferred_element_type=jnp.float32)
                p = p + jnp.dot(slabs[1], w_ref[1, dj],
                                preferred_element_type=jnp.float32)
                p = p + jnp.dot(slabs[2], w_ref[2, dj],
                                preferred_element_type=jnp.float32)
                # out_flat[i] needs P[i + dj]  ->  accumulate at offset (2 - dj)
                off = 2 - dj
                acc_ref[off:off + m, :] += p

        acc = acc_ref[2:2 + m, :] + b_ref[...]
        # zero the 2 invalid halo columns of every row (flat index % W >= Wo)
        col = jax.lax.broadcasted_iota(jnp.int32, (m, 1), 0)
        col = (col & (w - 1)) if pow2 else (col % w)
        keep = (col < wo).astype(jnp.float32)
        yb = (acc * keep).astype(o_ref.dtype)
        o_ref[0] = yb
        # BN partial stats over the tensor that is actually normalized
        yf = yb.astype(jnp.float32)
        s_ref[0, 0:1, :] = jnp.sum(yf, axis=0, keepdims=True)
        s_ref[0, 1:2, :] = jnp.sum(yf * yf, axis=0, keepdims=True)

    return kernel


def conv3x3_flat(xs, ws, b, H, W):
    """xs: list of (N, H*W, Cin_i) bf16 (flattened NHWC); ws: list of
    (3,3,Cin_i,Cout) bf16; b: (Cout,) f32.

    Returns:
      y_flat : (N, (H-2)*W, Cout) bf16 -- valid conv + bias, halo columns zeroed
      stats  : (N, 2, Cout) f32       -- [sum, sum_sq] over valid outputs
    """
    N = xs[0].shape[0]
    Ho, Wo = H - 2, W - 2
    m = Ho * W
    Cout = ws[0].shape[3]
    TN = _pick_cblock(Cout)
    nJ = Cout // TN
    n_in = len(xs)

    kernel = _make_conv3x3_kernel(n_in, W, Ho, Wo)

    x_specs = [pl.BlockSpec((1, H * W, x.shape[-1]), lambda j, n: (n, 0, 0))
               for x in xs]
    w_specs = [pl.BlockSpec((3, 3, wt.shape[2], TN), lambda j, n: (0, 0, 0, j))
               for wt in ws]
    b_spec = pl.BlockSpec((1, TN), lambda j, n: (0, j))
    y_spec = pl.BlockSpec((1, m, TN), lambda j, n: (n, 0, j))
    s_spec = pl.BlockSpec((1, 2, TN), lambda j, n: (n, 0, j))

    y, stats = pl.pallas_call(
        kernel,
        out_shape=(jax.ShapeDtypeStruct((N, m, Cout), jnp.bfloat16),
                   jax.ShapeDtypeStruct((N, 2, Cout), jnp.float32)),
        grid_spec=pltpu.PrefetchScalarGridSpec(
            num_scalar_prefetch=0,
            grid=(nJ, N),                       # cout-block outermost: weight
            in_specs=x_specs + w_specs + [b_spec],  # block resident per j
            out_specs=(y_spec, s_spec),
            scratch_shapes=[pltpu.VMEM((m + 8, TN), jnp.float32)]),
        compiler_params=pltpu.CompilerParams(
            dimension_semantics=("parallel", "parallel"),
            vmem_limit_bytes=_VMEM_LIMIT),
    )(*xs, *ws, b.reshape(1, Cout))
    return y, stats


# ----------------------------------------------------------------------------
# fused BatchNorm affine + ReLU + ReflectionPad2d(1)
# ----------------------------------------------------------------------------
def _bn_relu_pad_kernel(y_ref, s_ref, t_ref, o_ref):
    ho = o_ref.shape[1] - 2
    wo = o_ref.shape[2] - 2
    z = y_ref[0, :, 0:wo, :].astype(jnp.float32)          # drop zeroed halo cols
    z = jnp.maximum(z * s_ref[0] + t_ref[0], 0.0).astype(o_ref.dtype)  # (ho,wo,c)
    # interior + reflected ring (elementwise affine+relu commutes with padding)
    o_ref[0, 1:ho + 1, 1:wo + 1, :] = z
    o_ref[0, 1:ho + 1, 0:1, :] = z[:, 1:2, :]
    o_ref[0, 1:ho + 1, wo + 1:wo + 2, :] = z[:, wo - 2:wo - 1, :]
    o_ref[0, 0:1, 1:wo + 1, :] = z[1:2, :, :]
    o_ref[0, 0:1, 0:1, :] = z[1:2, 1:2, :]
    o_ref[0, 0:1, wo + 1:wo + 2, :] = z[1:2, wo - 2:wo - 1, :]
    o_ref[0, ho + 1:ho + 2, 1:wo + 1, :] = z[ho - 2:ho - 1, :, :]
    o_ref[0, ho + 1:ho + 2, 0:1, :] = z[ho - 2:ho - 1, 1:2, :]
    o_ref[0, ho + 1:ho + 2, wo + 1:wo + 2, :] = z[ho - 2:ho - 1, wo - 2:wo - 1, :]


def bn_relu_pad(y_flat, scale, shift, N, H, W):
    """pad(relu(y*scale+shift), reflect 1).  y_flat: (N, (H-2)*W, C) bf16 with
    zeroed halo columns; returns (N, H, W, C) bf16."""
    Ho = H - 2
    C = y_flat.shape[-1]
    y = y_flat.reshape(N, Ho, W, C)                       # free row-major view
    return pl.pallas_call(
        _bn_relu_pad_kernel,
        out_shape=jax.ShapeDtypeStruct((N, H, W, C), jnp.bfloat16),
        grid_spec=pltpu.PrefetchScalarGridSpec(
            num_scalar_prefetch=0,
            grid=(N,),
            in_specs=[pl.BlockSpec((1, Ho, W, C), lambda n: (n, 0, 0, 0)),
                      pl.BlockSpec((1, 1, C), lambda n: (0, 0, 0)),
                      pl.BlockSpec((1, 1, C), lambda n: (0, 0, 0))],
            out_specs=pl.BlockSpec((1, H, W, C), lambda n: (n, 0, 0, 0))),
        compiler_params=pltpu.CompilerParams(
            dimension_semantics=("parallel",),
            vmem_limit_bytes=_VMEM_LIMIT),
    )(y, scale.reshape(1, 1, C).astype(jnp.float32),
      shift.reshape(1, 1, C).astype(jnp.float32))


def bn_scale_shift(y_flat, stats, gamma, beta, N, H, W, eps=1e-5):
    """Training-mode BatchNorm2d statistics over the *padded* conv output:
    interior sums come from the conv kernel; the reflection ring is corrected
    with a few thin slices of y in JAX (tiny)."""
    Ho, Wo = H - 2, W - 2
    C = y_flat.shape[-1]
    y = y_flat.reshape(N, Ho, W, C)                       # halo cols are zero
    s = stats.sum(axis=0)                                 # (2, C)

    top = y[:, 1].astype(jnp.float32)                     # row duplicated up
    bot = y[:, Ho - 2].astype(jnp.float32)                # row duplicated down
    left = y[:, :, 1].astype(jnp.float32)
    right = y[:, :, Wo - 2].astype(jnp.float32)
    corners = [y[:, 1, 1], y[:, 1, Wo - 2], y[:, Ho - 2, 1], y[:, Ho - 2, Wo - 2]]
    corners = [c.astype(jnp.float32) for c in corners]

    ring1 = (top.sum((0, 1)) + bot.sum((0, 1)) + left.sum((0, 1))
             + right.sum((0, 1)) + sum(c.sum(0) for c in corners))
    ring2 = ((top * top).sum((0, 1)) + (bot * bot).sum((0, 1))
             + (left * left).sum((0, 1)) + (right * right).sum((0, 1))
             + sum((c * c).sum(0) for c in corners))

    count = N * H * W                                     # (Ho+2)*(Wo+2) = H*W
    mean = (s[0] + ring1) / count
    var = jnp.maximum((s[1] + ring2) / count - mean * mean, 0.0)  # biased var
    scale = gamma * jax.lax.rsqrt(var + eps)
    shift = beta - mean * scale
    return scale, shift


# ----------------------------------------------------------------------------
# MaxPool2d(2, 2) and plain matmul (+bias)
# ----------------------------------------------------------------------------
def _maxpool_kernel(x_ref, o_ref):
    # x_ref: (1, H, Wo2, 2C)  (W-pairs packed on the lane axis, free JAX view)
    c = o_ref.shape[3]
    t = x_ref[...]
    m = jnp.maximum(t[..., :c], t[..., c:])               # max over W pairs
    h = m.shape[1]
    m = m.reshape(1, h // 2, 2, m.shape[2], c)            # split leading H dim
    o_ref[...] = jnp.max(m, axis=2)                       # max over H pairs


def maxpool2x2(x):
    # MaxPool2d(2, stride=2, ceil_mode=True); spatial dims are always even here.
    # TODO(synk): partial (odd-size) ceil_mode windows are not handled.
    N, H, W, C = x.shape
    Ho, Wo = H // 2, W // 2
    xv = x.reshape(N, H, Wo, 2 * C)                       # free row-major view
    return pl.pallas_call(
        _maxpool_kernel,
        out_shape=jax.ShapeDtypeStruct((N, Ho, Wo, C), x.dtype),
        grid_spec=pltpu.PrefetchScalarGridSpec(
            num_scalar_prefetch=0,
            grid=(N,),
            in_specs=[pl.BlockSpec((1, H, Wo, 2 * C), lambda n: (n, 0, 0, 0))],
            out_specs=pl.BlockSpec((1, Ho, Wo, C), lambda n: (n, 0, 0, 0))),
        compiler_params=pltpu.CompilerParams(
            dimension_semantics=("parallel",),
            vmem_limit_bytes=_VMEM_LIMIT),
    )(xv)


def _matmul_bias_kernel(x_ref, w_ref, b_ref, o_ref):
    o_ref[...] = (jnp.dot(x_ref[...], w_ref[...],
                          preferred_element_type=jnp.float32)
                  + b_ref[...]).astype(o_ref.dtype)


def matmul_bias(x, w, b, out_dtype=jnp.bfloat16):
    """(M,K)@(K,Nc)+b[Nc]; full K per tile, bf16 MXU, f32 accumulate."""
    M, K = x.shape
    Nc = w.shape[1]
    TM = _pick_tm(M)
    TN = _pick_cblock(Nc)
    return pl.pallas_call(
        _matmul_bias_kernel,
        out_shape=jax.ShapeDtypeStruct((M, Nc), out_dtype),
        grid_spec=pltpu.PrefetchScalarGridSpec(
            num_scalar_prefetch=0,
            grid=(M // TM, Nc // TN),
            in_specs=[pl.BlockSpec((TM, K), lambda i, j: (i, 0)),
                      pl.BlockSpec((K, TN), lambda i, j: (0, j)),
                      pl.BlockSpec((1, TN), lambda i, j: (0, j))],
            out_specs=pl.BlockSpec((TM, TN), lambda i, j: (i, j))),
        compiler_params=pltpu.CompilerParams(
            dimension_semantics=("parallel", "parallel"),
            vmem_limit_bytes=_VMEM_LIMIT),
    )(x, w, b.reshape(1, Nc))


# ----------------------------------------------------------------------------
# UNet building blocks (NHWC bf16 internally)
# ----------------------------------------------------------------------------
def down_block(xs, p, H, W):
    """xs: list of (N, H, W, Cin_i) inputs (two entries = fused skip concat)."""
    N = xs[0].shape[0]
    xs_flat = [x.reshape(N, H * W, x.shape[-1]) for x in xs]
    y1, st1 = conv3x3_flat(xs_flat, p["w1s"], p["b1"], H, W)
    sc, sh = bn_scale_shift(y1, st1, p["g1"], p["be1"], N, H, W)
    z1 = bn_relu_pad(y1, sc, sh, N, H, W)                 # (N, H, W, C)
    C = z1.shape[-1]
    y2, st2 = conv3x3_flat([z1.reshape(N, H * W, C)], [p["w2"]], p["b2"], H, W)
    sc, sh = bn_scale_shift(y2, st2, p["g2"], p["be2"], N, H, W)
    return bn_relu_pad(y2, sc, sh, N, H, W)


def conv_transpose2x2_s2(x, wm, bm):
    """ConvTranspose2d(kernel=2, stride=2); wm: (Cin, 4*Cout) bf16 with column
    order (a, b, cout); bm: (4*Cout,) f32."""
    N, H, W, Cin = x.shape
    Cout = wm.shape[1] // 4
    y = matmul_bias(x.reshape(N * H * W, Cin), wm, bm)
    y = y.reshape(N, H, W, 2, 2, Cout)
    y = jnp.transpose(y, (0, 1, 3, 2, 4, 5))              # leading-dim permute
    return y.reshape(N, 2 * H, 2 * W, Cout)


def up_block(x1, skip, p, h, w):
    u = conv_transpose2x2_s2(x1, p["up_w"], p["up_b"])    # (N, 2h, 2w, Cout)
    # skip concat fused into the conv: two inputs, weight pre-split along Cin
    return down_block([u, skip], p["conv"], 2 * h, 2 * w)


def conv1x1(x, wm, b):
    # TODO(synk): n_classes=2 -> lane-sparse output stores; pad the class dim
    # in-kernel if this layer ever shows up in a profile.
    N, H, W, Cin = x.shape
    Cout = wm.shape[1]
    y = matmul_bias(x.reshape(N * H * W, Cin), wm, b, out_dtype=jnp.float32)
    return y.reshape(N, H, W, Cout)


def unet_forward(x_nchw, pp):
    x = jnp.transpose(x_nchw, (0, 2, 3, 1)).astype(jnp.bfloat16)  # NCHW->NHWC
    N, H, W = x.shape[0], x.shape[1], x.shape[2]
    c1 = down_block([x], pp["d1"], H, W);                 p1 = maxpool2x2(c1)
    c2 = down_block([p1], pp["d2"], H // 2, W // 2);      p2 = maxpool2x2(c2)
    c3 = down_block([p2], pp["d3"], H // 4, W // 4);      p3 = maxpool2x2(c3)
    c4 = down_block([p3], pp["d4"], H // 8, W // 8);      p4 = maxpool2x2(c4)
    c5 = down_block([p4], pp["d5"], H // 16, W // 16)
    u5 = up_block(c5, c4, pp["u5"], H // 16, W // 16)
    u4 = up_block(u5, c3, pp["u4"], H // 8, W // 8)
    u3 = up_block(u4, c2, pp["u3"], H // 4, W // 4)
    u2 = up_block(u3, c1, pp["u2"], H // 2, W // 2)
    out = conv1x1(u2, pp["out_w"], pp["out_b"])
    return jnp.transpose(out, (0, 3, 1, 2))               # NHWC -> NCHW, f32


# ----------------------------------------------------------------------------
# Parameters: deterministic init in PyTorch layout + one-time kernel-layout prep
# ----------------------------------------------------------------------------
def init_down_block(key, cin, cout):
    k = jax.random.split(key, 4)
    s = 0.05
    return dict(
        w1=s * jax.random.normal(k[0], (cout, cin, 3, 3), jnp.float32),
        b1=s * jax.random.normal(k[1], (cout,), jnp.float32),
        g1=jnp.ones((cout,), jnp.float32),
        be1=jnp.zeros((cout,), jnp.float32),
        w2=s * jax.random.normal(k[2], (cout, cout, 3, 3), jnp.float32),
        b2=s * jax.random.normal(k[3], (cout,), jnp.float32),
        g2=jnp.ones((cout,), jnp.float32),
        be2=jnp.zeros((cout,), jnp.float32))


def init_up_block(key, cin, cout):
    k = jax.random.split(key, 3)
    s = 0.05
    return dict(
        up_w=s * jax.random.normal(k[0], (cin, cout, 2, 2), jnp.float32),
        up_b=s * jax.random.normal(k[1], (cout,), jnp.float32),
        conv=init_down_block(k[2], 2 * cout, cout))


def init_unet(key, n_channels, n_classes):
    ks = jax.random.split(key, 12)
    return dict(
        d1=init_down_block(ks[0], n_channels, 64),
        d2=init_down_block(ks[1], 64, 128),
        d3=init_down_block(ks[2], 128, 256),
        d4=init_down_block(ks[3], 256, 512),
        d5=init_down_block(ks[4], 512, 1024),
        u5=init_up_block(ks[5], 1024, 512),
        u4=init_up_block(ks[6], 512, 256),
        u3=init_up_block(ks[7], 256, 128),
        u2=init_up_block(ks[8], 128, 64),
        out_w=0.05 * jax.random.normal(ks[9], (n_classes, 64, 1, 1), jnp.float32),
        out_b=0.05 * jax.random.normal(ks[10], (n_classes,), jnp.float32))


def prepare_params(params):
    """One-time conversion to kernel layouts: bf16 weights, NHWC-friendly axes,
    up-path conv1 weights split along Cin (fused skip concat)."""
    def conv_w(w):                      # (Cout,Cin,3,3) -> (3,3,Cin,Cout) bf16
        return jnp.transpose(w, (2, 3, 1, 0)).astype(jnp.bfloat16)

    def down(p, split=None):
        w1 = conv_w(p["w1"])
        w1s = [w1] if split is None else [w1[:, :, :split, :], w1[:, :, split:, :]]
        return dict(
            w1s=w1s, b1=p["b1"].astype(jnp.float32),
            g1=p["g1"].astype(jnp.float32), be1=p["be1"].astype(jnp.float32),
            w2=conv_w(p["w2"]), b2=p["b2"].astype(jnp.float32),
            g2=p["g2"].astype(jnp.float32), be2=p["be2"].astype(jnp.float32))

    def up(p):
        ci, co = p["up_w"].shape[0], p["up_w"].shape[1]
        wm = jnp.transpose(p["up_w"], (0, 2, 3, 1)).reshape(ci, 4 * co)
        return dict(up_w=wm.astype(jnp.bfloat16),
                    up_b=jnp.tile(p["up_b"], 4).astype(jnp.float32),
                    conv=down(p["conv"], split=co))

    ncls, cin = params["out_w"].shape[0], params["out_w"].shape[1]
    return dict(
        d1=down(params["d1"]), d2=down(params["d2"]), d3=down(params["d3"]),
        d4=down(params["d4"]), d5=down(params["d5"]),
        u5=up(params["u5"]), u4=up(params["u4"]),
        u3=up(params["u3"]), u2=up(params["u2"]),
        out_w=params["out_w"].reshape(ncls, cin).T.astype(jnp.bfloat16),
        out_b=params["out_b"].astype(jnp.float32))


# ----------------------------------------------------------------------------
# self-test of the restructured conv / bn_relu_pad kernels (small shapes)
# ----------------------------------------------------------------------------
def _reference_conv3x3(x, w, b):
    n, h, wd, _ = x.shape
    ho, wo = h - 2, wd - 2
    out = jnp.zeros((n, ho, wo, w.shape[3]), jnp.float32)
    for di in range(3):
        for dj in range(3):
            out = out + jnp.einsum("nhwc,cd->nhwd",
                                   x[:, di:di + ho, dj:dj + wo, :], w[di, dj],
                                   precision=jax.lax.Precision.HIGHEST)
    return out + b


def _selftest():
    key = jax.random.PRNGKey(1)
    kx, kw, kb, ks, kt = jax.random.split(key, 5)
    N, H, W, Cin, Cout = 2, 16, 16, 32, 64
    x = jax.random.normal(kx, (N, H, W, Cin), jnp.float32).astype(jnp.bfloat16)
    wgt = (0.1 * jax.random.normal(kw, (3, 3, Cin, Cout))).astype(jnp.bfloat16)
    b = jax.random.normal(kb, (Cout,), jnp.float32)
    ref = _reference_conv3x3(x.astype(jnp.float32), wgt.astype(jnp.float32), b)
    tol = 2e-2 * float(jnp.max(jnp.abs(ref))) + 1e-3

    def run(xs, ws):
        xs_f = [xx.reshape(N, H * W, xx.shape[-1]) for xx in xs]
        yf, st = conv3x3_flat(xs_f, ws, b, H, W)
        yv = yf.reshape(N, H - 2, W, Cout)[:, :, :W - 2, :].astype(jnp.float32)
        return yf, yv, st

    cases = [run([x], [wgt]),
             run([x[..., :Cin // 2], x[..., Cin // 2:]],
                 [wgt[:, :, :Cin // 2, :], wgt[:, :, Cin // 2:, :]])]
    for yf, yv, st in cases:
        assert float(jnp.max(jnp.abs(yv - ref))) <= tol, "conv mismatch"
        ssum = st.sum(axis=0)
        ysum = yv.sum((0, 1, 2))
        ysq = (yv * yv).sum((0, 1, 2))
        assert float(jnp.max(jnp.abs(ssum[0] - ysum))) <= \
            5e-2 * (1.0 + float(jnp.max(jnp.abs(ysum)))), "stats sum mismatch"
        assert float(jnp.max(jnp.abs(ssum[1] - ysq))) <= \
            5e-2 * (1.0 + float(jnp.max(jnp.abs(ysq)))), "stats sumsq mismatch"

    # bn_relu_pad vs relu(affine) + XLA reflect-pad on the same bf16 tensor
    yf, yv, _ = cases[0]
    sc = (jnp.abs(jax.random.normal(ks, (Cout,))) + 0.5).astype(jnp.float32)
    sh = (0.1 * jax.random.normal(kt, (Cout,))).astype(jnp.float32)
    z = bn_relu_pad(yf, sc, sh, N, H, W).astype(jnp.float32)
    zr = jnp.maximum(yv * sc + sh, 0.0).astype(jnp.bfloat16)
    zr = jnp.pad(zr, ((0, 0), (1, 1), (1, 1), (0, 0)),
                 mode="reflect").astype(jnp.float32)
    ptol = 2e-2 * float(jnp.max(jnp.abs(zr))) + 2e-2
    assert float(jnp.max(jnp.abs(z - zr))) <= ptol, "bn_relu_pad mismatch"


if __name__ == "__main__":
    n_channels, n_classes = 3, 2
    # Spatial 64 is the smallest power-of-two size for which the original
    # PyTorch module runs (after 4 pools the 4x4 map still supports the valid
    # 3x3 conv + ReflectionPad2d(1) in DownBlock5).
    batch, H, W = 1, 64, 64

    root = jax.random.PRNGKey(0)
    kx, kp = jax.random.split(root)
    x = jax.random.normal(kx, (batch, n_channels, H, W), jnp.float32)
    params = init_unet(kp, n_channels, n_classes)
    pp = prepare_params(params)

    _selftest()

    fwd = jax.jit(unet_forward)
    out = jax.block_until_ready(fwd(x, pp))

    assert out.shape == (batch, n_classes, H, W), out.shape
    assert bool(jnp.all(jnp.isfinite(out)))
    print("KERNEL_OK")
</pallas_src>

<mosaic_0001>
module attributes {stable_mosaic.version = 11 : i64} {
  func.func @kernel(%arg0: i32, %arg1: i32, %arg2: memref<1x256x32xbf16, #tpu.memory_space<vmem>>, %arg3: memref<3x3x32x64xbf16, #tpu.memory_space<vmem>>, %arg4: memref<1x64xf32, #tpu.memory_space<vmem>>, %arg5: memref<1x224x64xbf16, #tpu.memory_space<vmem>>, %arg6: memref<1x2x64xf32, #tpu.memory_space<vmem>>, %arg7: memref<232x64xf32, #tpu.memory_space<vmem>>) attributes {dimension_semantics = [#tpu.dimension_semantics<parallel>, #tpu.dimension_semantics<parallel>], iteration_bounds = array<i64: 1, 2>, scalar_prefetch = 0 : i64, scratch_operands = 1 : i64, tpu.core_type = #tpu.core_type<tc>, window_params = [{transform_indices = @transform_0, window_bounds = array<i64: 1, 256, 32>}, {transform_indices = @transform_1, window_bounds = array<i64: 3, 3, 32, 64>}, {transform_indices = @transform_2, window_bounds = array<i64: 1, 64>}, {transform_indices = @transform_3, window_bounds = array<i64: 1, 224, 64>}, {transform_indices = @transform_4, window_bounds = array<i64: 1, 2, 64>}]} {
    %cst = arith.constant 0.000000e+00 : f32
    %0 = vector.broadcast %cst : f32 to vector<232x64xf32>
    %c0 = arith.constant 0 : index
    %c0_0 = arith.constant 0 : index
    %1 = vector.load %arg7[%c0, %c0_0] : memref<232x64xf32, #tpu.memory_space<vmem>>, vector<232x64xf32>
    tpu.vector_store %arg7[%c0, %c0_0], %0 {strides = array<i32>} : memref<232x64xf32, #tpu.memory_space<vmem>>, vector<232x64xf32>,
    %c0_1 = arith.constant 0 : index
    %c0_2 = arith.constant 0 : index
    %c0_3 = arith.constant 0 : index
    %2 = vector.load %arg2[%c0_1, %c0_2, %c0_3] : memref<1x256x32xbf16, #tpu.memory_space<vmem>>, vector<1x224x32xbf16>
    %3 = vector.shape_cast %2 : vector<1x224x32xbf16> to vector<224x32xbf16>
    %c0_4 = arith.constant 0 : index
    %c16 = arith.constant 16 : index
    %c0_5 = arith.constant 0 : index
    %4 = vector.load %arg2[%c0_4, %c16, %c0_5] : memref<1x256x32xbf16, #tpu.memory_space<vmem>>, vector<1x224x32xbf16>
    %5 = vector.shape_cast %4 : vector<1x224x32xbf16> to vector<224x32xbf16>
    %c0_6 = arith.constant 0 : index
    %c32 = arith.constant 32 : index
    %c0_7 = arith.constant 0 : index
    %6 = vector.load %arg2[%c0_6, %c32, %c0_7] : memref<1x256x32xbf16, #tpu.memory_space<vmem>>, vector<1x224x32xbf16>
    %7 = vector.shape_cast %6 : vector<1x224x32xbf16> to vector<224x32xbf16>
    %c0_8 = arith.constant 0 : index
    %c0_9 = arith.constant 0 : index
    %c0_10 = arith.constant 0 : index
    %c0_11 = arith.constant 0 : index
    %8 = vector.load %arg3[%c0_8, %c0_9, %c0_10, %c0_11] : memref<3x3x32x64xbf16, #tpu.memory_space<vmem>>, vector<1x1x32x64xbf16>
    %9 = vector.shape_cast %8 : vector<1x1x32x64xbf16> to vector<32x64xbf16>
    %cst_12 = arith.constant dense<0.000000e+00> : vector<224x64xf32>
    %10 = tpu.matmul %3, %9, %cst_12 {dimension_numbers = #tpu.dot_dimension_numbers<[1], [0], [0], [1], [0, 0, 1, 1], [], []>} : vector<224x32xbf16>, vector<32x64xbf16>, vector<224x64xf32> -> vector<224x64xf32>
    %c1 = arith.constant 1 : index
    %c0_13 = arith.constant 0 : index
    %c0_14 = arith.constant 0 : index
    %c0_15 = arith.constant 0 : index
    %11 = vector.load %arg3[%c1, %c0_13, %c0_14, %c0_15] : memref<3x3x32x64xbf16, #tpu.memory_space<vmem>>, vector<1x1x32x64xbf16>
    %12 = vector.shape_cast %11 : vector<1x1x32x64xbf16> to vector<32x64xbf16>
    %cst_16 = arith.constant dense<0.000000e+00> : vector<224x64xf32>
    %13 = tpu.matmul %5, %12, %cst_16 {dimension_numbers = #tpu.dot_dimension_numbers<[1], [0], [0], [1], [0, 0, 1, 1], [], []>} : vector<224x32xbf16>, vector<32x64xbf16>, vector<224x64xf32> -> vector<224x64xf32>
    %14 = arith.addf %10, %13 : vector<224x64xf32>
    %c2 = arith.constant 2 : index
    %c0_17 = arith.constant 0 : index
    %c0_18 = arith.constant 0 : index
    %c0_19 = arith.constant 0 : index
    %15 = vector.load %arg3[%c2, %c0_17, %c0_18, %c0_19] : memref<3x3x32x64xbf16, #tpu.memory_space<vmem>>, vector<1x1x32x64xbf16>
    %16 = vector.shape_cast %15 : vector<1x1x32x64xbf16> to vector<32x64xbf16>
    %cst_20 = arith.constant dense<0.000000e+00> : vector<224x64xf32>
    %17 = tpu.matmul %7, %16, %cst_20 {dimension_numbers = #tpu.dot_dimension_numbers<[1], [0], [0], [1], [0, 0, 1, 1], [], []>} : vector<224x32xbf16>, vector<32x64xbf16>, vector<224x64xf32> -> vector<224x64xf32>
    %18 = arith.addf %14, %17 : vector<224x64xf32>
    %c2_21 = arith.constant 2 : index
    %c0_22 = arith.constant 0 : index
    %19 = vector.load %arg7[%c2_21, %c0_22] : memref<232x64xf32, #tpu.memory_space<vmem>>, vector<224x64xf32>
    %20 = arith.addf %19, %18 : vector<224x64xf32>
    %c2_23 = arith.constant 2 : index
    %c0_24 = arith.constant 0 : index
    %21 = vector.load %arg7[%c2_23, %c0_24] : memref<232x64xf32, #tpu.memory_space<vmem>>, vector<224x64xf32>
    tpu.vector_store %arg7[%c2_23, %c0_24], %20 {strides = array<i32>} : memref<232x64xf32, #tpu.memory_space<vmem>>, vector<224x64xf32>,
    %c0_25 = arith.constant 0 : index
    %c1_26 = arith.constant 1 : index
    %c0_27 = arith.constant 0 : index
    %c0_28 = arith.constant 0 : index
    %22 = vector.load %arg3[%c0_25, %c1_26, %c0_27, %c0_28] : memref<3x3x32x64xbf16, #tpu.memory_space<vmem>>, vector<1x1x32x64xbf16>
    %23 = vector.shape_cast %22 : vector<1x1x32x64xbf16> to vector<32x64xbf16>
    %cst_29 = arith.constant dense<0.000000e+00> : vector<224x64xf32>
    %24 = tpu.matmul %3, %23, %cst_29 {dimension_numbers = #tpu.dot_dimension_numbers<[1], [0], [0], [1], [0, 0, 1, 1], [], []>} : vector<224x32xbf16>, vector<32x64xbf16>, vector<224x64xf32> -> vector<224x64xf32>
    %c1_30 = arith.constant 1 : index
    %c1_31 = arith.constant 1 : index
    %c0_32 = arith.constant 0 : index
    %c0_33 = arith.constant 0 : index
    %25 = vector.load %arg3[%c1_30, %c1_31, %c0_32, %c0_33] : memref<3x3x32x64xbf16, #tpu.memory_space<vmem>>, vector<1x1x32x64xbf16>
    %26 = vector.shape_cast %25 : vector<1x1x32x64xbf16> to vector<32x64xbf16>
    %cst_34 = arith.constant dense<0.000000e+00> : vector<224x64xf32>
    %27 = tpu.matmul %5, %26, %cst_34 {dimension_numbers = #tpu.dot_dimension_numbers<[1], [0], [0], [1], [0, 0, 1, 1], [], []>} : vector<224x32xbf16>, vector<32x64xbf16>, vector<224x64xf32> -> vector<224x64xf32>
    %28 = arith.addf %24, %27 : vector<224x64xf32>
    %c2_35 = arith.constant 2 : index
    %c1_36 = arith.constant 1 : index
    %c0_37 = arith.constant 0 : index
    %c0_38 = arith.constant 0 : index
    %29 = vector.load %arg3[%c2_35, %c1_36, %c0_37, %c0_38] : memref<3x3x32x64xbf16, #tpu.memory_space<vmem>>, vector<1x1x32x64xbf16>
    %30 = vector.shape_cast %29 : vector<1x1x32x64xbf16> to vector<32x64xbf16>
    %cst_39 = arith.constant dense<0.000000e+00> : vector<224x64xf32>
    %31 = tpu.matmul %7, %30, %cst_39 {dimension_numbers = #tpu.dot_dimension_numbers<[1], [0], [0], [1], [0, 0, 1, 1], [], []>} : vector<224x32xbf16>, vector<32x64xbf16>, vector<224x64xf32> -> vector<224x64xf32>
    %32 = arith.addf %28, %31 : vector<224x64xf32>
    %c1_40 = arith.constant 1 : index
    %c0_41 = arith.constant 0 : index
    %33 = vector.load %arg7[%c1_40, %c0_41] : memref<232x64xf32, #tpu.memory_space<vmem>>, vector<224x64xf32>
    %34 = arith.addf %33, %32 : vector<224x64xf32>
    %c1_42 = arith.constant 1 : index
    %c0_43 = arith.constant 0 : index
    %35 = vector.load %arg7[%c1_42, %c0_43] : memref<232x64xf32, #tpu.memory_space<vmem>>, vector<224x64xf32>
    tpu.vector_store %arg7[%c1_42, %c0_43], %34 {strides = array<i32>} : memref<232x64xf32, #tpu.memory_space<vmem>>, vector<224x64xf32>,
    %c0_44 = arith.constant 0 : index
    %c2_45 = arith.constant 2 : index
    %c0_46 = arith.constant 0 : index
    %c0_47 = arith.constant 0 : index
    %36 = vector.load %arg3[%c0_44, %c2_45, %c0_46, %c0_47] : memref<3x3x32x64xbf16, #tpu.memory_space<vmem>>, vector<1x1x32x64xbf16>
    %37 = vector.shape_cast %36 : vector<1x1x32x64xbf16> to vector<32x64xbf16>
    %cst_48 = arith.constant dense<0.000000e+00> : vector<224x64xf32>
    %38 = tpu.matmul %3, %37, %cst_48 {dimension_numbers = #tpu.dot_dimension_numbers<[1], [0], [0], [1], [0, 0, 1, 1], [], []>} : vector<224x32xbf16>, vector<32x64xbf16>, vector<224x64xf32> -> vector<224x64xf32>
    %c1_49 = arith.constant 1 : index
    %c2_50 = arith.constant 2 : index
    %c0_51 = arith.constant 0 : index
    %c0_52 = arith.constant 0 : index
    %39 = vector.load %arg3[%c1_49, %c2_50, %c0_51, %c0_52] : memref<3x3x32x64xbf16, #tpu.memory_space<vmem>>, vector<1x1x32x64xbf16>
    %40 = vector.shape_cast %39 : vector<1x1x32x64xbf16> to vector<32x64xbf16>
    %cst_53 = arith.constant dense<0.000000e+00> : vector<224x64xf32>
    %41 = tpu.matmul %5, %40, %cst_53 {dimension_numbers = #tpu.dot_dimension_numbers<[1], [0], [0], [1], [0, 0, 1, 1], [], []>} : vector<224x32xbf16>, vector<32x64xbf16>, vector<224x64xf32> -> vector<224x64xf32>
    %42 = arith.addf %38, %41 : vector<224x64xf32>
    %c2_54 = arith.constant 2 : index
    %c2_55 = arith.constant 2 : index
    %c0_56 = arith.constant 0 : index
    %c0_57 = arith.constant 0 : index
    %43 = vector.load %arg3[%c2_54, %c2_55, %c0_56, %c0_57] : memref<3x3x32x64xbf16, #tpu.memory_space<vmem>>, vector<1x1x32x64xbf16>
    %44 = vector.shape_cast %43 : vector<1x1x32x64xbf16> to vector<32x64xbf16>
    %cst_58 = arith.constant dense<0.000000e+00> : vector<224x64xf32>
    %45 = tpu.matmul %7, %44, %cst_58 {dimension_numbers = #tpu.dot_dimension_numbers<[1], [0], [0], [1], [0, 0, 1, 1], [], []>} : vector<224x32xbf16>, vector<32x64xbf16>, vector<224x64xf32> -> vector<224x64xf32>
    %46 = arith.addf %42, %45 : vector<224x64xf32>
    %c0_59 = arith.constant 0 : index
    %c0_60 = arith.constant 0 : index
    %47 = vector.load %arg7[%c0_59, %c0_60] : memref<232x64xf32, #tpu.memory_space<vmem>>, vector<224x64xf32>
    %48 = arith.addf %47, %46 : vector<224x64xf32>
    %c0_61 = arith.constant 0 : index
    %c0_62 = arith.constant 0 : index
    %49 = vector.load %arg7[%c0_61, %c0_62] : memref<232x64xf32, #tpu.memory_space<vmem>>, vector<224x64xf32>
    tpu.vector_store %arg7[%c0_61, %c0_62], %48 {strides = array<i32>} : memref<232x64xf32, #tpu.memory_space<vmem>>, vector<224x64xf32>,
    %c2_63 = arith.constant 2 : index
    %c0_64 = arith.constant 0 : index
    %50 = vector.load %arg7[%c2_63, %c0_64] : memref<232x64xf32, #tpu.memory_space<vmem>>, vector<224x64xf32>
    %c0_65 = arith.constant 0 : index
    %c0_66 = arith.constant 0 : index
    %51 = vector.load %arg4[%c0_65, %c0_66] : memref<1x64xf32, #tpu.memory_space<vmem>>, vector<1x64xf32>
    %52 = vector.broadcast %51 : vector<1x64xf32> to vector<224x64xf32>
    %53 = arith.addf %50, %52 : vector<224x64xf32>
    %54 = tpu.iota {dimensions = array<i32: 0>} : vector<224x1xi32>
    %c15_i32 = arith.constant 15 : i32
    %55 = vector.broadcast %c15_i32 : i32 to vector<224x1xi32>
    %56 = arith.andi %54, %55 : vector<224x1xi32>
    %c14_i32 = arith.constant 14 : i32
    %57 = vector.broadcast %c14_i32 : i32 to vector<224x1xi32>
    %58 = arith.cmpi slt, %56, %57 : vector<224x1xi32>
    %59 = arith.extui %58 : vector<224x1xi1> to vector<224x1xi32>
    %60 = arith.sitofp %59 : vector<224x1xi32> to vector<224x1xf32>
    %61 = vector.broadcast %60 : vector<224x1xf32> to vector<224x64xf32>
    %62 = arith.mulf %53, %61 : vector<224x64xf32>
    %63 = arith.truncf %62 : vector<224x64xf32> to vector<224x64xbf16>
    %c0_67 = arith.constant 0 : index
    %c0_68 = arith.constant 0 : index
    %c0_69 = arith.constant 0 : index
    %64 = vector.load %arg5[%c0_67, %c0_68, %c0_69] : memref<1x224x64xbf16, #tpu.memory_space<vmem>>, vector<1x224x64xbf16>
    %65 = vector.shape_cast %64 : vector<1x224x64xbf16> to vector<224x64xbf16>
    %66 = vector.shape_cast %63 : vector<224x64xbf16> to vector<1x224x64xbf16>
    tpu.vector_store %arg5[%c0_67, %c0_68, %c0_69], %66 {strides = array<i32>} : memref<1x224x64xbf16, #tpu.memory_space<vmem>>, vector<1x224x64xbf16>,
    %67 = arith.extf %63 : vector<224x64xbf16> to vector<224x64xf32>
    %cst_70 = arith.constant dense<0.000000e+00> : vector<64xf32>
    %68 = vector.multi_reduction <add>, %67, %cst_70 [0] : vector<224x64xf32> to vector<64xf32>
    %69 = vector.shape_cast %68 : vector<64xf32> to vector<1x64xf32>
    %c0_71 = arith.constant 0 : index
    %c0_72 = arith.constant 0 : index
    %c0_73 = arith.constant 0 : index
    %70 = vector.load %arg6[%c0_71, %c0_72, %c0_73] : memref<1x2x64xf32, #tpu.memory_space<vmem>>, vector<1x1x64xf32>
    %71 = vector.shape_cast %70 : vector<1x1x64xf32> to vector<1x64xf32>
    %72 = vector.shape_cast %69 : vector<1x64xf32> to vector<1x1x64xf32>
    tpu.vector_store %arg6[%c0_71, %c0_72, %c0_73], %72 {strides = array<i32>} : memref<1x2x64xf32, #tpu.memory_space<vmem>>, vector<1x1x64xf32>,
    %73 = arith.mulf %67, %67 : vector<224x64xf32>
    %cst_74 = arith.constant dense<0.000000e+00> : vector<64xf32>
    %74 = vector.multi_reduction <add>, %73, %cst_74 [0] : vector<224x64xf32> to vector<64xf32>
    %75 = vector.shape_cast %74 : vector<64xf32> to vector<1x64xf32>
    %c0_75 = arith.constant 0 : index
    %c1_76 = arith.constant 1 : index
    %c0_77 = arith.constant 0 : index
    %76 = vector.load %arg6[%c0_75, %c1_76, %c0_77] : memref<1x2x64xf32, #tpu.memory_space<vmem>>, vector<1x1x64xf32>
    %77 = vector.shape_cast %76 : vector<1x1x64xf32> to vector<1x64xf32>
    %78 = vector.shape_cast %75 : vector<1x64xf32> to vector<1x1x64xf32>
    tpu.vector_store %arg6[%c0_75, %c1_76, %c0_77], %78 {strides = array<i32>} : memref<1x2x64xf32, #tpu.memory_space<vmem>>, vector<1x1x64xf32>,
    return
  }
  func.func @transform_0(%arg0: i32, %arg1: i32) -> (i32, i32, i32) {
    %c0_i32 = arith.constant 0 : i32
    %c0_i32_0 = arith.constant 0 : i32
    %c0_i32_1 = arith.constant 0 : i32
    return %arg1, %c0_i32, %c0_i32_0 : i32, i32, i32
  }
  func.func @transform_1(%arg0: i32, %arg1: i32) -> (i32, i32, i32, i32) {
    %c0_i32 = arith.constant 0 : i32
    %c0_i32_0 = arith.constant 0 : i32
    %c0_i32_1 = arith.constant 0 : i32
    %c0_i32_2 = arith.constant 0 : i32
    return %c0_i32, %c0_i32_0, %c0_i32_1, %arg0 : i32, i32, i32, i32
  }
  func.func @transform_2(%arg0: i32, %arg1: i32) -> (i32, i32) {
    %c0_i32 = arith.constant 0 : i32
    %c0_i32_0 = arith.constant 0 : i32
    return %c0_i32, %arg0 : i32, i32
  }
  func.func @transform_3(%arg0: i32, %arg1: i32) -> (i32, i32, i32) {
    %c0_i32 = arith.constant 0 : i32
    %c0_i32_0 = arith.constant 0 : i32
    return %arg1, %c0_i32, %arg0 : i32, i32, i32
  }
  func.func @transform_4(%arg0: i32, %arg1: i32) -> (i32, i32, i32) {
    %c0_i32 = arith.constant 0 : i32
    %c0_i32_0 = arith.constant 0 : i32
    return %arg1, %c0_i32, %arg0 : i32, i32, i32
  }
}

</mosaic_0001>

<bundles_post_ra>
// kernel: tpu_custom_call.1
= control target key start
LH: loop header
LB: loop body
LE: loop exit
PB: predicated region body
PF: predicated region fallthrough
CT: control target
= control target key end

     0   :  { %10 = vsyncpa [#allocation4], 0  ;;  %s5225_s0 = inlined_call_operand.vmem [shape: bf16[2,256,32], index: 0, kind: input, shape index: {}]   ;;  %s5226_s1 = inlined_call_operand.vmem [shape: bf16[3,3,32,64], index: 1, kind: input, shape index: {}]   ;;  %s5227_s2 = inlined_call_operand.vmem [shape: f32[1,64], index: 2, kind: input, shape index: {}]   ;;  %s5228_s3 = inlined_call_operand.vmem [shape: bf16[2,224,64], index: 3, kind: output, shape index: {0}]   ;;  %s5229_s4 = inlined_call_operand.hbm [shape: f32[2,2,64], index: 4, kind: output, shape index: {1}]  }
   0x1   :  { %12 = vsyncpa [#allocation4 + $0x1], 0  ;;  %s3869_s15 = smov 0   ;;  %s3871_s16 = smov 0  }
   0x2   :  { %s3873_s17 = smov 0   ;;  %s3875_s18 = smov 0  }
   0x3   :  { %s3877_s19 = smov 0   ;;  %s3879_s20 = smov 0  }
   0x4 LB: > { %s2958_s21 = sadd.s32 4294967295, %s3840_s20   ;;  %s2959_s22 = sadd.s32 4294967294, %s3840_s20   ;;  %s3840_s20 = sphi %s3879_s20, %s18_s20   ;;  %s3836_s19 = sphi %s3877_s19, %s5273_s19   ;;  %s3832_s18 = sphi %s3875_s18, %s5272_s18   ;;  %s3828_s17 = sphi %s3873_s17, %s5271_s17   ;;  %s3824_s16 = sphi %s3871_s16, %s5270_s16   ;;  %s3820_s15 = sphi %s3869_s15, %s5269_s15  }
   0x5   : > { %s27_s23 = sadd.s32 1, %s3836_s19  ;;  %s145_s24 = sadd.s32 1, %s3828_s17 }
   0x6   : > { %p28_p0 = scmp.ge.s32.totalorder %s27_s23, 2  ;;  %p155_p1 = scmp.ne.s32.totalorder %s3828_s17, %s3824_s16 }
   0x7   : > { %p156_p2 = scmp.eq.s32.totalorder %s2958_s21, 1  ;;  %p161_p3 = scmp.ne.s32.totalorder %s3824_s16, %s3820_s15 }
   0x8   : > { %s5275_s23 = smov (%p28_p0, %s27_s23), 0  ;;  %p162_p5 = scmp.eq.s32.totalorder %s2959_s22, 1 }
   0x9   : > { %p3909_p4 = por %p156_p2, %p155_p1  ;;  %s140_s26 = ssub.s32 %s3836_s19, %s5275_s23 }
   0xa   : > { %p2964_p6 = scmp.ge.s32.totalorder %s3840_s20, 1  ;;  %p143_p7 = scmp.eq.s32.totalorder %s140_s26, 0 }
   0xb   : > { %p3916_p8 = por %p162_p5, %p161_p3  ;;  %p201_p9 = scmp.lt.s32.totalorder %s3840_s20, 3 }
   0xc   : > { %s3922_s28 = scalar_select %p143_p7, %s3828_s17, %s145_s24  }
   0xd   : > { %p202_p10 = pnand %p2964_p6, %p201_p9 }
   0xf   : > { %205 = sbr.rel (%p202_p10) target bundleno = 562 (0x232), region = 32 }
  0x14   : > { %v3730_v0 = vld [vmem:[%s5226_s1 + $0x38] sm:$0xff]   ;;  %p242_p11 = scmp.lt.s32.totalorder %s3832_s18, 1  ;;  %v3731_v1 = vld [vmem:[%s5226_s1 + $0x30] sm:$0xff]   ;;  %v3736_v2 = vld [vmem:[%s5226_s1 + $0x68] sm:$0xff]   ;;  %vm416_vm0 = vcmask 261120   ;;  %vm263_vm1 = vcmask 523264  }
  0x15   : > { %3381 = vmatprep.subr.bf16.mxu0 %v3730_v0  ;;  %3669 = vmatprep.subr.bf16.mxu1 %v3730_v0  ;;  %v3737_v3 = vld [vmem:[%s5226_s1 + $0x8] sm:$0xff]   ;;  %v3746_v6 = vld [vmem:[%s5226_s1 + $0x60] sm:$0xff]   ;;  %v3752_v19 = vld [vmem:[%s5226_s1 + $0x18] sm:$0xff]   ;;  %v5230_v32 = vmov 0.0   ;;  %vm2591_vm4 = vcmask 519168   ;;  %s3205_s6 = sshll.u32 %s3832_s18, 5 }
  0x16   : > { %s3932_s7 = scalar_select %p242_p11, %s3832_s18, 1  ;;  %3382 = vmatpush3.bf16.msra.mxu0 %v3730_v0  ;;  %3671 = vmatpush3.bf16.msra.mxu1 %v3730_v0  ;;  %v3747_v8 = vld [vmem:[%s5226_s1] sm:$0xff]   ;;  %v3751_v18 = vld [vmem:[%s5226_s1 + $0x48] sm:$0xff]   ;;  %v3756_v24 = vld [vmem:[%s5226_s1 + $0x78] sm:$0xff]   ;;  %266 = vst.msk [vmem:[#allocation2 + $0x10] sm:$0xff] %vm263_vm1, %v5230_v32 }
  0x17   : > { %3383 = vmatprep.subr.bf16.mxu0 %v3731_v1  ;;  %3670 = vmatprep.subr.bf16.mxu1 %v3731_v1  ;;  %v3753_v23 = vld [vmem:[%s5226_s1 + $0x40] sm:$0xff]   ;;  %v3754_v25 = vld [vmem:[%s5226_s1 + $0x10] sm:$0xff]   ;;  %v3757_v26 = vld [vmem:[%s5226_s1 + $0x58] sm:$0xff]   ;;  %267 = vst.msk [vmem:[#allocation2 + $0x18] sm:$0xff] %vm263_vm1, %v5230_v32  ;;  %s2825_s11 = scalar_lea.hbm %s5229_s4, %s3205_s6 }
  0x18   : > { %s3208_s8 = sshll.u32 %s3932_s7, 7  ;;  %v3758_v28 = vld [vmem:[%s5226_s1 + $0x70] sm:$0xff]   ;;  %v4116_v29 = vld [vmem:[%s5226_s1 + $0x28] sm:$0xff]   ;;  %264 = vst.msk [vmem:[#allocation2] sm:$0xff] %vm263_vm1, %v5230_v32  ;;  %265 = vst.msk [vmem:[#allocation2 + $0x8] sm:$0xff] %vm263_vm1, %v5230_v32  ;;  %s3673_s21 = smul.u32 112, %s3932_s7 }
  0x19   : > { %s3941_s13 = scalar_lea.vmem %s5225_s0, %s3208_s8  ;;  %v3759_v30 = vld [vmem:[%s5226_s1 + $0x50] sm:$0xff]   ;;  %v4133_v31 = vld [vmem:[%s5226_s1 + $0x88] sm:$0xff]   ;;  %268 = vst.msk [vmem:[#allocation2 + $0x20] sm:$0xff] %vm263_vm1, %v5230_v32  ;;  %269 = vst.msk [vmem:[#allocation2 + $0x28] sm:$0xff] %vm263_vm1, %v5230_v32 }
  0x1a   : > { %v3947_v4 = vld [vmem:[%s3941_s13 + $0x8] sm:$0xff]   ;;  %3384 = vmatpush3.bf16.msra.mxu0 %v3731_v1  ;;  %3672 = vmatpush3.bf16.msra.mxu1 %v3731_v1  ;;  %v3958_v7 = vld [vmem:[%s3941_s13 + $0x10] sm:$0xff]   ;;  %v3971_v10 = vld [vmem:[%s3941_s13 + $0x18] sm:$0xff]   ;;  %270 = vst.msk [vmem:[#allocation2 + $0x30] sm:$0xff] %vm263_vm1, %v5230_v32  ;;  %s4751_s29 = scalar_lea.vmem %s5228_s3, %s3673_s21  ;;  %s3843_s21 = smov [#allocation3]  }
  0x1b   : > { %v3950_v5 = vld [vmem:[%s3941_s13 + $0x48] sm:$0xff]   ;;  %3385 = vmatprep.mubr.msk.bf16.mxu0 %vm416_vm0, %v3947_v4  ;;  %3445 = vmatprep.subr.bf16.mxu0 %v3736_v2  ;;  %v3966_v9 = vld [vmem:[%s3941_s13 + $0x50] sm:$0xff]   ;;  %v3976_v11 = vld [vmem:[%s3941_s13 + $0x58] sm:$0xff]   ;;  %271 = vst.msk [vmem:[#allocation2 + $0x38] sm:$0xff] %vm263_vm1, %v5230_v32  ;;  %s3768_s22 = sshll.u32 %s3843_s21, 4  ;;  %s3769_s22 = int_to_ptr.vmem [resolvable:$false] %s3768_s22 }
  0x1c   : > { %3401 = vmatprep.mubr.msk.bf16.mxu1 %vm416_vm0, %v3950_v5  ;;  %3413 = vmatprep.subr.bf16.mxu1 %v3737_v3  ;;  %v3983_v12 = vld [vmem:[%s3941_s13 + $0x20] sm:$0xff]   ;;  %v3989_v14 = vld [vmem:[%s3941_s13 + $0x28] sm:$0xff]   ;;  %v4003_v16 = vld [vmem:[%s3941_s13 + $0x30] sm:$0xff]   ;;  %272 = vst.msk [vmem:[#allocation2 + $0x40] sm:$0xff] %vm263_vm1, %v5230_v32  ;;  %s3770_s24 = scalar_lea.vmem %s3769_s22, 64 }
  0x1d   : > { %3386 = vmatmul.mubr.msk.bf16.vlgmr.msra.gmra.mxu0 %vm416_vm0, %v3958_v7  ;;  %3402 = vmatmul.mubr.msk.bf16.vlgmr.msra.gmra.mxu1 %vm416_vm0, %v3966_v9  ;;  %v3986_v13 = vld [vmem:[%s3941_s13 + $0x60] sm:$0xff]   ;;  %v3992_v15 = vld [vmem:[%s3941_s13 + $0x68] sm:$0xff]   ;;  %v4006_v17 = vld [vmem:[%s3941_s13 + $0x70] sm:$0xff]   ;;  %273 = vst.msk [vmem:[#allocation2 + $0x48] sm:$0xff] %vm263_vm1, %v5230_v32 }
  0x1e   : > { %3446 = vmatpush3.bf16.msra.mxu0 %v3736_v2  ;;  %3389 = vmatprep.mubr.msk.bf16.mxu0 %vm416_vm0, %v3971_v10  ;;  %v4015_v20 = vld [vmem:[%s3941_s13 + $0x38] sm:$0xff]   ;;  %v4018_v21 = vld [vmem:[%s3941_s13] sm:$0xff]   ;;  %274 = vst.msk [vmem:[#allocation2 + $0x50] sm:$0xff] %vm263_vm1, %v5230_v32  ;;  %275 = vst.msk [vmem:[#allocation2 + $0x58] sm:$0xff] %vm263_vm1, %v5230_v32 }
  0x1f   : > { %3414 = vmatpush3.bf16.msra.mxu1 %v3737_v3  ;;  %3405 = vmatprep.mubr.msk.bf16.mxu1 %vm416_vm0, %v3976_v11  ;;  %v4029_v22 = vld [vmem:[%s3941_s13 + $0x40] sm:$0xff]   ;;  %v4100_v27 = vld [vmem:[%s3941_s13 + $0x78] sm:$0xff]   ;;  %276 = vst.msk [vmem:[#allocation2 + $0x60] sm:$0xff] %vm263_vm1, %v5230_v32  ;;  %277 = vst.msk [vmem:[#allocation2 + $0x68] sm:$0xff] %vm263_vm1, %v5230_v32  ;;  %s239_s13 = sand.u32 1, %s3824_s16  }
  0x20   : > { %3447 = vmatprep.subr.bf16.mxu0 %v3746_v6  ;;  %3415 = vmatprep.subr.bf16.mxu1 %v3747_v8  ;;  %278 = vst.msk [vmem:[#allocation2 + $0x70] sm:$0xff] %vm263_vm1, %v5230_v32  ;;  %279 = vst.msk [vmem:[#allocation2 + $0x78] sm:$0xff] %vm263_vm1, %v5230_v32  ;;  %v3762_v33 = vld [vmem:[%s5226_s1 + $0x20] sm:$0xff]   ;;  %s2965_s30 = sshll.u32 %s239_s13, 1  ;;  %s2810_s12 = scalar_lea.sflag [#allocation4], %s239_s13 }
  0x21   : > { %280 = vst.msk [vmem:[#allocation2 + $0x80] sm:$0xff] %vm263_vm1, %v5230_v32  ;;  %281 = vst.msk [vmem:[#allocation2 + $0x88] sm:$0xff] %vm263_vm1, %v5230_v32  ;;  %v3763_v34 = vld [vmem:[%s5226_s1 + $0x80] sm:$0xff]   ;;  %s241_s5 = scalar_lea.vmem [#allocation3], %s2965_s30 }
  0x22   : > { %3448 = vmatpush3.bf16.msra.mxu0 %v3746_v6  ;;  %282 = vst.msk [vmem:[#allocation2 + $0x90] sm:$0xff] %vm263_vm1, %v5230_v32  ;;  %283 = vst.msk [vmem:[#allocation2 + $0x98] sm:$0xff] %vm263_vm1, %v5230_v32  ;;  %v969_v6 = vld [vmem:[#allocation2 + $0x12] sm:$0xff]  ;;  %s2827_s8 = sshll.u32 %s241_s5, 4  ;;  %s2828_s8 = int_to_ptr.vmem [resolvable:$true] %s2827_s8 }
  0x23   : > { %3416 = vmatpush3.bf16.msra.mxu1 %v3747_v8  ;;  %3509 = vmatprep.subr.bf16.mxu0 %v3752_v19  ;;  %284 = vst.msk [vmem:[#allocation2 + $0xa0] sm:$0xff] %vm263_vm1, %v5230_v32  ;;  %285 = vst.msk [vmem:[#allocation2 + $0xa8] sm:$0xff] %vm263_vm1, %v5230_v32  ;;  %s3764_s14 = scalar_lea.vmem %s2828_s8, 32  ;;  %p3771_p1 = scmp.lt.s32.totalorder %s2828_s8, %s3769_s22 }
  0x24   : > { %3477 = vmatprep.subr.bf16.mxu1 %v3751_v18  ;;  %286 = vst.msk [vmem:[#allocation2 + $0xb0] sm:$0xff] %vm263_vm1, %v5230_v32  ;;  %287 = vst.msk [vmem:[#allocation2 + $0xb8] sm:$0xff] %vm263_vm1, %v5230_v32  ;;  %p3765_p12 = scmp.ne.s32.totalorder %s2828_s8, %s3764_s14  ;;  %p3772_p2 = scmp.lt.s32.totalorder %s3770_s24, %s3764_s14 }
  0x25   : > { %3390 = vmatmul.mubr.msk.bf16.gmra.mxu0 %vm416_vm0, %v3983_v12  ;;  %3406 = vmatmul.mubr.msk.bf16.gmra.mxu1 %vm416_vm0, %v3986_v13  ;;  %288 = vst.msk [vmem:[#allocation2 + $0xc0] sm:$0xff] %vm263_vm1, %v5230_v32  ;;  %289 = vst.msk [vmem:[#allocation2 + $0xc8] sm:$0xff] %vm263_vm1, %v5230_v32 }
  0x26   : > { %3393 = vmatprep.mubr.msk.bf16.mxu0 %vm416_vm0, %v3989_v14  ;;  %3409 = vmatprep.mubr.msk.bf16.mxu1 %vm416_vm0, %v3992_v15  ;;  %290 = vst.msk [vmem:[#allocation2 + $0xd0] sm:$0xff] %vm263_vm1, %v5230_v32  ;;  %291 = vst.msk [vmem:[#allocation2 + $0xd8] sm:$0xff] %vm263_vm1, %v5230_v32  ;;  %p3766_p13 = pnand %p3765_p12, %p3909_p4  ;;  %p3773_p3 = por %p3772_p2, %p3771_p1 }
  0x27   : > { %292 = vst.msk [vmem:[#allocation2 + $0xe0] sm:$0xff] %vm263_vm1, %v5230_v32 }
  0x28   : > { %p3767_p0 = pneg %p3766_p13 }
  0x2a   : > { %p3774_p5 = pnand %p3773_p3, %p3767_p0 }
  0x2d   : > { %3394 = vmatmul.mubr.msk.bf16.gmra.mxu0 %vm416_vm0, %v4003_v16  ;;  %3410 = vmatmul.mubr.msk.bf16.gmra.mxu1 %vm416_vm0, %v4006_v17 }
  0x2e   : > { %3397 = vmatprep.mubr.msk.bf16.mxu0 %vm416_vm0, %v4015_v20  ;;  %3417 = vmatprep.mubr.msk.bf16.mxu1 %vm416_vm0, %v4018_v21 }
  0x35   : > { %3398 = vmatmul.mubr.msk.bf16.gmra.mxu0 %vm416_vm0, %v4029_v22  ;;  %3418 = vmatmul.mubr.msk.bf16.vlgmr.msra.gmra.mxu1 %vm416_vm0, %v3947_v4 }
  0x36   : > { %3449 = vmatprep.mubr.msk.bf16.mxu0 %vm416_vm0, %v3958_v7  ;;  %3421 = vmatprep.mubr.msk.bf16.mxu1 %vm416_vm0, %v3958_v7 }
  0x37   : > { %3478 = vmatpush3.bf16.msra.mxu1 %v3751_v18 }
  0x38   : > { %3479 = vmatprep.subr.bf16.mxu1 %v3753_v23 }
  0x3b   : > { %3480 = vmatpush3.bf16.msra.mxu1 %v3753_v23 }
  0x3c   : > { %3541 = vmatprep.subr.bf16.mxu1 %v3756_v24 }
  0x3d   : > { %3450 = vmatmul.mubr.msk.bf16.vlgmr.msra.gmra.mxu0 %vm416_vm0, %v3971_v10  ;;  %3422 = vmatmul.mubr.msk.bf16.gmra.mxu1 %vm416_vm0, %v3971_v10 }
  0x3e   : > { %3510 = vmatpush3.bf16.msra.mxu0 %v3752_v19  ;;  %3425 = vmatprep.mubr.msk.bf16.mxu1 %vm416_vm0, %v3983_v12 }
  0x3f   : > { %3453 = vmatprep.mubr.msk.bf16.mxu0 %vm416_vm0, %v3983_v12  ;;  %3511 = vmatprep.subr.bf16.mxu0 %v3754_v25 }
  0x42   : > { %3512 = vmatpush3.bf16.msra.mxu0 %v3754_v25 }
  0x43   : > { %3573 = vmatprep.subr.bf16.mxu0 %v3757_v26 }
  0x45   : > { %3454 = vmatmul.mubr.msk.bf16.gmra.mxu0 %vm416_vm0, %v3989_v14  ;;  %3426 = vmatmul.mubr.msk.bf16.gmra.mxu1 %vm416_vm0, %v3989_v14 }
  0x46   : > { %3457 = vmatprep.mubr.msk.bf16.mxu0 %vm416_vm0, %v4003_v16  ;;  %3429 = vmatprep.mubr.msk.bf16.mxu1 %vm416_vm0, %v4003_v16 }
  0x4d   : > { %3458 = vmatmul.mubr.msk.bf16.gmra.mxu0 %vm416_vm0, %v4015_v20  ;;  %3430 = vmatmul.mubr.msk.bf16.gmra.mxu1 %vm416_vm0, %v4015_v20 }
  0x4e   : > { %3461 = vmatprep.mubr.msk.bf16.mxu0 %vm416_vm0, %v4029_v22  ;;  %3433 = vmatprep.mubr.msk.bf16.mxu1 %vm416_vm0, %v4029_v22 }
  0x55   : > { %3462 = vmatmul.mubr.msk.bf16.gmra.mxu0 %vm416_vm0, %v3950_v5  ;;  %3434 = vmatmul.mubr.msk.bf16.gmra.mxu1 %vm416_vm0, %v3950_v5 }
  0x56   : > { %3465 = vmatprep.mubr.msk.bf16.mxu0 %vm416_vm0, %v3966_v9  ;;  %3437 = vmatprep.mubr.msk.bf16.mxu1 %vm416_vm0, %v3966_v9 }
  0x5d   : > { %3466 = vmatmul.mubr.msk.bf16.gmra.mxu0 %vm416_vm0, %v3976_v11  ;;  %3438 = vmatmul.mubr.msk.bf16.gmra.mxu1 %vm416_vm0, %v3976_v11 }
  0x5e   : > { %3469 = vmatprep.mubr.msk.bf16.mxu0 %vm416_vm0, %v3986_v13  ;;  %3441 = vmatprep.mubr.msk.bf16.mxu1 %vm416_vm0, %v3986_v13 }
  0x65   : > { %3470 = vmatmul.mubr.msk.bf16.gmra.mxu0 %vm416_vm0, %v3992_v15  ;;  %3442 = vmatmul.mubr.msk.bf16.gmra.mxu1 %vm416_vm0, %v3992_v15 }
  0x66   : > { %3473 = vmatprep.mubr.msk.bf16.mxu0 %vm416_vm0, %v4006_v17  ;;  %3481 = vmatprep.mubr.msk.bf16.mxu1 %vm416_vm0, %v3947_v4 }
  0x6d   : > { %3474 = vmatmul.mubr.msk.bf16.gmra.mxu0 %vm416_vm0, %v4100_v27  ;;  %3482 = vmatmul.mubr.msk.bf16.vlgmr.msra.gmra.mxu1 %vm416_vm0, %v3958_v7 }
  0x6e   : > { %3513 = vmatprep.mubr.msk.bf16.mxu0 %vm416_vm0, %v4018_v21  ;;  %3485 = vmatprep.mubr.msk.bf16.mxu1 %vm416_vm0, %v3971_v10 }
  0x6f   : > { %3542 = vmatpush3.bf16.msra.mxu1 %v3756_v24 }
  0x70   : > { %3543 = vmatprep.subr.bf16.mxu1 %v3758_v28 }
  0x73   : > { %3544 = vmatpush3.bf16.msra.mxu1 %v3758_v28  ;;  %v968_v28 = vld [vmem:[#allocation2 + $0xa] sm:$0xff] }
  0x74   : > { %3605 = vmatprep.subr.bf16.mxu1 %v4116_v29 }
  0x75   : > { %3514 = vmatmul.mubr.msk.bf16.vlgmr.msra.gmra.mxu0 %vm416_vm0, %v3947_v4  ;;  %3486 = vmatmul.mubr.msk.bf16.gmra.mxu1 %vm416_vm0, %v3983_v12 }
  0x76   : > { %3574 = vmatpush3.bf16.msra.mxu0 %v3757_v26  ;;  %3489 = vmatprep.mubr.msk.bf16.mxu1 %vm416_vm0, %v3989_v14 }
  0x77   : > { %3517 = vmatprep.mubr.msk.bf16.mxu0 %vm416_vm0, %v3958_v7  ;;  %3575 = vmatprep.subr.bf16.mxu0 %v3759_v30 }
  0x7a   : > { %3576 = vmatpush3.bf16.msra.mxu0 %v3759_v30 }
  0x7b   : > { %3637 = vmatprep.subr.bf16.mxu0 %v4133_v31 }
  0x7d   : > { %3518 = vmatmul.mubr.msk.bf16.gmra.mxu0 %vm416_vm0, %v3971_v10  ;;  %3490 = vmatmul.mubr.msk.bf16.gmra.mxu1 %vm416_vm0, %v4003_v16 }
  0x7e   : > { %3521 = vmatprep.mubr.msk.bf16.mxu0 %vm416_vm0, %v3983_v12  ;;  %3493 = vmatprep.mubr.msk.bf16.mxu1 %vm416_vm0, %v4015_v20 }
  0x85   : > { %3522 = vmatmul.mubr.msk.bf16.gmra.mxu0 %vm416_vm0, %v3989_v14  ;;  %3494 = vmatmul.mubr.msk.bf16.gmra.mxu1 %vm416_vm0, %v4029_v22 }
  0x86   : > { %3525 = vmatprep.mubr.msk.bf16.mxu0 %vm416_vm0, %v4003_v16  ;;  %3497 = vmatprep.mubr.msk.bf16.mxu1 %vm416_vm0, %v3950_v5 }
  0x8d   : > { %3526 = vmatmul.mubr.msk.bf16.gmra.mxu0 %vm416_vm0, %v4015_v20  ;;  %3498 = vmatmul.mubr.msk.bf16.gmra.mxu1 %vm416_vm0, %v3966_v9 }
  0x8e   : > { %3529 = vmatprep.mubr.msk.bf16.mxu0 %vm416_vm0, %v4029_v22  ;;  %3501 = vmatprep.mubr.msk.bf16.mxu1 %vm416_vm0, %v3976_v11 }
  0x95   : > { %3530 = vmatmul.mubr.msk.bf16.gmra.mxu0 %vm416_vm0, %v3950_v5  ;;  %3502 = vmatmul.mubr.msk.bf16.gmra.mxu1 %vm416_vm0, %v3986_v13 }
  0x96   : > { %3533 = vmatprep.mubr.msk.bf16.mxu0 %vm416_vm0, %v3966_v9  ;;  %3505 = vmatprep.mubr.msk.bf16.mxu1 %vm416_vm0, %v3992_v15 }
  0x9d   : > { %3534 = vmatmul.mubr.msk.bf16.gmra.mxu0 %vm416_vm0, %v3976_v11  ;;  %3506 = vmatmul.mubr.msk.bf16.gmra.mxu1 %vm416_vm0, %v4006_v17 }
  0x9e   : > { %3537 = vmatprep.mubr.msk.bf16.mxu0 %vm416_vm0, %v3986_v13  ;;  %3545 = vmatprep.mubr.msk.bf16.mxu1 %vm416_vm0, %v3958_v7 }
  0xa5   : > { %3538 = vmatmul.mubr.msk.bf16.gmra.mxu0 %vm416_vm0, %v3992_v15  ;;  %3546 = vmatmul.mubr.msk.bf16.vlgmr.msra.gmra.mxu1 %vm416_vm0, %v3971_v10 }
  0xa6   : > { %3577 = vmatprep.mubr.msk.bf16.mxu0 %vm416_vm0, %v3947_v4  ;;  %3549 = vmatprep.mubr.msk.bf16.mxu1 %vm416_vm0, %v3983_v12 }
  0xa7   : > { %3606 = vmatpush3.bf16.msra.mxu1 %v4116_v29 }
  0xa8   : > { %3607 = vmatprep.subr.bf16.mxu1 %v3762_v33 }
  0xab   : > { %3608 = vmatpush3.bf16.msra.mxu1 %v3762_v33 }
  0xad   : > { %3578 = vmatmul.mubr.msk.bf16.vlgmr.msra.gmra.mxu0 %vm416_vm0, %v3958_v7  ;;  %3550 = vmatmul.mubr.msk.bf16.gmra.mxu1 %vm416_vm0, %v3989_v14 }
  0xae   : > { %3638 = vmatpush3.bf16.msra.mxu0 %v4133_v31  ;;  %3553 = vmatprep.mubr.msk.bf16.mxu1 %vm416_vm0, %v4003_v16 }
  0xaf   : > { %3581 = vmatprep.mubr.msk.bf16.mxu0 %vm416_vm0, %v3971_v10  ;;  %3639 = vmatprep.subr.bf16.mxu0 %v3763_v34 }
  0xb2   : > { %3640 = vmatpush3.bf16.msra.mxu0 %v3763_v34  ;;  %v973_v34 = vld [vmem:[#allocation2 + $0x32] sm:$0xff] }
  0xb5   : > { %3582 = vmatmul.mubr.msk.bf16.gmra.mxu0 %vm416_vm0, %v3983_v12  ;;  %3554 = vmatmul.mubr.msk.bf16.gmra.mxu1 %vm416_vm0, %v4015_v20 }
  0xb6   : > { %3585 = vmatprep.mubr.msk.bf16.mxu0 %vm416_vm0, %v3989_v14  ;;  %3557 = vmatprep.mubr.msk.bf16.mxu1 %vm416_vm0, %v4029_v22 }
  0xbd   : > { %3586 = vmatmul.mubr.msk.bf16.gmra.mxu0 %vm416_vm0, %v4003_v16  ;;  %3558 = vmatmul.mubr.msk.bf16.gmra.mxu1 %vm416_vm0, %v3950_v5 }
  0xbe   : > { %3589 = vmatprep.mubr.msk.bf16.mxu0 %vm416_vm0, %v4015_v20  ;;  %3561 = vmatprep.mubr.msk.bf16.mxu1 %vm416_vm0, %v3966_v9 }
  0xc5   : > { %3590 = vmatmul.mubr.msk.bf16.gmra.mxu0 %vm416_vm0, %v4029_v22  ;;  %3562 = vmatmul.mubr.msk.bf16.gmra.mxu1 %vm416_vm0, %v3976_v11 }
  0xc6   : > { %3593 = vmatprep.mubr.msk.bf16.mxu0 %vm416_vm0, %v3950_v5  ;;  %3565 = vmatprep.mubr.msk.bf16.mxu1 %vm416_vm0, %v3986_v13 }
  0xcd   : > { %3594 = vmatmul.mubr.msk.bf16.gmra.mxu0 %vm416_vm0, %v3966_v9  ;;  %3566 = vmatmul.mubr.msk.bf16.gmra.mxu1 %vm416_vm0, %v3992_v15 }
  0xce   : > { %3597 = vmatprep.mubr.msk.bf16.mxu0 %vm416_vm0, %v3976_v11  ;;  %3569 = vmatprep.mubr.msk.bf16.mxu1 %vm416_vm0, %v4006_v17 }
  0xd5   : > { %3598 = vmatmul.mubr.msk.bf16.gmra.mxu0 %vm416_vm0, %v3986_v13  ;;  %3570 = vmatmul.mubr.msk.bf16.gmra.mxu1 %vm416_vm0, %v4100_v27 }
  0xd6   : > { %3601 = vmatprep.mubr.msk.bf16.mxu0 %vm416_vm0, %v3992_v15  ;;  %3609 = vmatprep.mubr.msk.bf16.mxu1 %vm416_vm0, %v4018_v21 }
  0xdd   : > { %v3387_v35 = vpop.f32.mrf.mxu0  ;;  %3602 = vmatmul.mubr.msk.bf16.gmra.mxu0 %vm416_vm0, %v4006_v17  ;;  %v4300_v36 = vpop.f32.mrf.mxu1  ;;  %3610 = vmatmul.mubr.msk.bf16.vlgmr.msra.gmra.mxu1 %vm416_vm0, %v3947_v4 }
  0xde   : > { %3641 = vmatprep.mubr.msk.bf16.mxu0 %vm416_vm0, %v3958_v7  ;;  %3613 = vmatprep.mubr.msk.bf16.mxu1 %vm416_vm0, %v3958_v7 }
  0xdf   : > { %v493_v37 = vpop.f32.mrf.mxu0  ;;  %v4308_v38 = vpop.f32.mrf.mxu1 }
  0xe1   : > { %v3388_v39 = vpop.f32.mrf.mxu0  ;;  %v4310_v40 = vpop.f32.mrf.mxu1 }
  0xe3   : > { %v496_v41 = vpop.f32.mrf.mxu0  ;;  %v4312_v42 = vpop.f32.mrf.mxu1 }
  0xe5   : > { %v3391_v43 = vpop.f32.mrf.mxu0  ;;  %3642 = vmatmul.mubr.msk.bf16.vlgmr.msra.gmra.mxu0 %vm416_vm0, %v3971_v10  ;;  %v4316_v44 = vpop.f32.mrf.mxu1  ;;  %3614 = vmatmul.mubr.msk.bf16.gmra.mxu1 %vm416_vm0, %v3971_v10 }
  0xe6   : > { %3645 = vmatprep.mubr.msk.bf16.mxu0 %vm416_vm0, %v3983_v12  ;;  %3617 = vmatprep.mubr.msk.bf16.mxu1 %vm416_vm0, %v3983_v12 }
  0xe7   : > { %v4322_v45 = vpop.f32.mrf.mxu0  ;;  %v4326_v46 = vpop.f32.mrf.mxu1 }
  0xe9   : > { %v4328_v47 = vpop.f32.mrf.mxu0  ;;  %v4330_v48 = vpop.f32.mrf.mxu1 }
  0xeb   : > { %v4332_v49 = vpop.f32.mrf.mxu0  ;;  %v4334_v50 = vpop.f32.mrf.mxu1 }
  0xed   : > { %v4336_v51 = vpop.f32.mrf.mxu0  ;;  %3646 = vmatmul.mubr.msk.bf16.gmra.mxu0 %vm416_vm0, %v3989_v14  ;;  %v4340_v52 = vpop.f32.mrf.mxu1  ;;  %3618 = vmatmul.mubr.msk.bf16.gmra.mxu1 %vm416_vm0, %v3989_v14  ;;  %v967_v14 = vld [vmem:[#allocation2 + $0x2] sm:$0xff] }
  0xee   : > { %3649 = vmatprep.mubr.msk.bf16.mxu0 %vm416_vm0, %v4003_v16  ;;  %3621 = vmatprep.mubr.msk.bf16.mxu1 %vm416_vm0, %v4003_v16 }
  0xef   : > { %v4346_v53 = vpop.f32.mrf.mxu0  ;;  %v4350_v54 = vpop.f32.mrf.mxu1 }
  0xf1   : > { %v4352_v55 = vpop.f32.mrf.mxu0  ;;  %v4354_v56 = vpop.f32.mrf.mxu1 }
  0xf3   : > { %v4356_v57 = vpop.f32.mrf.mxu0  ;;  %v4358_v58 = vpop.f32.mrf.mxu1 }
  0xf5   : > { %v4360_v59 = vpop.f32.mrf.mxu0  ;;  %3650 = vmatmul.mubr.msk.bf16.gmra.mxu0 %vm416_vm0, %v4015_v20  ;;  %v3419_v60 = vpop.f32.mrf.mxu1  ;;  %3622 = vmatmul.mubr.msk.bf16.gmra.mxu1 %vm416_vm0, %v4015_v20 }
  0xf6   : > { %3653 = vmatprep.mubr.msk.bf16.mxu0 %vm416_vm0, %v4029_v22  ;;  %3625 = vmatprep.mubr.msk.bf16.mxu1 %vm416_vm0, %v4029_v22  ;;  %v667_v2 = vadd.f32 %v3419_v60, %v3387_v35  ;;  %v970_v22 = vld [vmem:[#allocation2 + $0x1a] sm:$0xff]  ;;  %v971_v60 = vld [vmem:[#allocation2 + $0x22] sm:$0xff] }
  0xf7   : > { %v4368_v61 = vpop.f32.mrf.mxu0  ;;  %v658_v62 = vpop.f32.mrf.mxu1 }
  0xf8   : > { %v659_v7 = vadd.f32 %v658_v62, %v493_v37 }
  0xf9   : > { %v4372_v63 = vpop.f32.mrf.mxu0  ;;  %v3420_v0 = vpop.f32.mrf.mxu1 }
  0xfa   : > { %v670_v16 = vadd.f32 %v3420_v0, %v3388_v39 }
  0xfb   : > { %v4374_v1 = vpop.f32.mrf.mxu0  ;;  %v661_v3 = vpop.f32.mrf.mxu1 }
  0xfc   : > { %v662_v23 = vadd.f32 %v661_v3, %v496_v41 }
  0xfd   : > { %v3451_v4 = vpop.f32.mrf.mxu0  ;;  %3654 = vmatmul.mubr.msk.bf16.gmra.mxu0 %vm416_vm0, %v3950_v5  ;;  %v3423_v8 = vpop.f32.mrf.mxu1  ;;  %3626 = vmatmul.mubr.msk.bf16.gmra.mxu1 %vm416_vm0, %v3950_v5 }
  0xfe   : > { %v941_v10 = vadd.f32 %v3451_v4, %v667_v2  ;;  %3657 = vmatprep.mubr.msk.bf16.mxu0 %vm416_vm0, %v3966_v9  ;;  %3629 = vmatprep.mubr.msk.bf16.mxu1 %vm416_vm0, %v3966_v9  ;;  %v683_v29 = vadd.f32 %v3423_v8, %v3391_v43  ;;  %v974_v4 = vld [vmem:[#allocation2 + $0x3a] sm:$0xff] }
  0xff   : > { %v828_v12 = vpop.f32.mrf.mxu0  ;;  %v674_v19 = vpop.f32.mrf.mxu1 }
 0x100   : > { %v997_v18 = vadd.f32 %v969_v6, %v941_v10  ;;  %v939_v20 = vadd.f32 %v828_v12, %v659_v7  ;;  %v675_v35 = vadd.f32 %v674_v19, %v4322_v45  ;;  %v972_v12 = vld [vmem:[#allocation2 + $0x2a] sm:$0xff]  ;;  %v977_v19 = vld [vmem:[#allocation2 + $0x52] sm:$0xff] }
 0x101   : > { %v3452_v21 = vpop.f32.mrf.mxu0  ;;  %v3424_v25 = vpop.f32.mrf.mxu1 }
 0x102   : > { %1025 = vst.msk [vmem:[#allocation2 + $0x12] sm:$0xff] %vm263_vm1, %v997_v18  ;;  %v995_v24 = vadd.f32 %v967_v14, %v939_v20  ;;  %v942_v5 = vadd.f32 %v3452_v21, %v670_v16  ;;  %v686_v62 = vadd.f32 %v3424_v25, %v4328_v47 }
 0x103   : > { %v831_v26 = vpop.f32.mrf.mxu0  ;;  %v677_v31 = vpop.f32.mrf.mxu1 }
 0x104   : > { %1023 = vst.msk [vmem:[#allocation2 + $0x2] sm:$0xff] %vm263_vm1, %v995_v24  ;;  %v998_v30 = vadd.f32 %v970_v22, %v942_v5  ;;  %v940_v9 = vadd.f32 %v831_v26, %v662_v23  ;;  %v678_v6 = vadd.f32 %v677_v31, %v4332_v49  ;;  %v975_v23 = vld [vmem:[#allocation2 + $0x42] sm:$0xff] }
 0x105   : > { %v3455_v33 = vpop.f32.mrf.mxu0  ;;  %3658 = vmatmul.mubr.msk.bf16.gmra.mxu0 %vm416_vm0, %v3976_v11  ;;  %v3427_v39 = vpop.f32.mrf.mxu1  ;;  %3630 = vmatmul.mubr.msk.bf16.gmra.mxu1 %vm416_vm0, %v3976_v11 }
 0x106   : > { %1026 = vst.msk [vmem:[#allocation2 + $0x1a] sm:$0xff] %vm263_vm1, %v998_v30  ;;  %v996_v37 = vadd.f32 %v968_v28, %v940_v9  ;;  %v945_v41 = vadd.f32 %v3455_v33, %v683_v29  ;;  %3661 = vmatprep.mubr.msk.bf16.mxu0 %vm416_vm0, %v3986_v13  ;;  %3633 = vmatprep.mubr.msk.bf16.mxu1 %vm416_vm0, %v3986_v13  ;;  %v978_v28 = vld [vmem:[#allocation2 + $0x5a] sm:$0xff] }
 0x107   : > { %v844_v43 = vpop.f32.mrf.mxu0  ;;  %v690_v0 = vpop.f32.mrf.mxu1  ;;  %v699_v13 = vadd.f32 %v3427_v39, %v4336_v51  ;;  %v981_v39 = vld [vmem:[#allocation2 + $0x72] sm:$0xff] }
 0x108   : > { %1024 = vst.msk [vmem:[#allocation2 + $0xa] sm:$0xff] %vm263_vm1, %v996_v37  ;;  %v1001_v45 = vadd.f32 %v973_v34, %v945_v41  ;;  %v943_v2 = vadd.f32 %v844_v43, %v675_v35  ;;  %v691_v49 = vadd.f32 %v690_v0, %v4346_v53 }
 0x109   : > { %v3456_v3 = vpop.f32.mrf.mxu0  ;;  %v3428_v7 = vpop.f32.mrf.mxu1 }
 0x10a   : > { %1029 = vst.msk [vmem:[#allocation2 + $0x32] sm:$0xff] %vm263_vm1, %v1001_v45  ;;  %v999_v11 = vadd.f32 %v971_v60, %v943_v2  ;;  %v946_v8 = vadd.f32 %v3456_v3, %v686_v62  ;;  %v702_v24 = vadd.f32 %v3428_v7, %v4352_v55  ;;  %v979_v45 = vld [vmem:[#allocation2 + $0x62] sm:$0xff] }
 0x10b   : > { %v847_v10 = vpop.f32.mrf.mxu0  ;;  %v693_v14 = vpop.f32.mrf.mxu1 }
 0x10c   : > { %1027 = vst.msk [vmem:[#allocation2 + $0x22] sm:$0xff] %vm263_vm1, %v999_v11  ;;  %v1002_v47 = vadd.f32 %v974_v4, %v946_v8  ;;  %v944_v16 = vadd.f32 %v847_v10, %v678_v6  ;;  %v694_v29 = vadd.f32 %v693_v14, %v4356_v57  ;;  %v982_v6 = vld [vmem:[#allocation2 + $0x7a] sm:$0xff]  ;;  %v980_v10 = vld [vmem:[#allocation2 + $0x6a] sm:$0xff] }
 0x10d   : > { %v3459_v18 = vpop.f32.mrf.mxu0  ;;  %3662 = vmatmul.mubr.msk.bf16.gmra.mxu0 %vm416_vm0, %v3992_v15  ;;  %v3431_v21 = vpop.f32.mrf.mxu1  ;;  %3634 = vmatmul.mubr.msk.bf16.gmra.mxu1 %vm416_vm0, %v3992_v15 }
 0x10e   : > { %1030 = vst.msk [vmem:[#allocation2 + $0x3a] sm:$0xff] %vm263_vm1, %v1002_v47  ;;  %v1000_v20 = vadd.f32 %v972_v12, %v944_v16  ;;  %v949_v22 = vadd.f32 %v3459_v18, %v699_v13  ;;  %3665 = vmatprep.mubr.msk.bf16.mxu0 %vm416_vm0, %v4006_v17  ;;  %v976_v17 = vld [vmem:[#allocation2 + $0x4a] sm:$0xff]  ;;  %v715_v33 = vadd.f32 %v3431_v21, %v4360_v59  ;;  %v985_v16 = vld [vmem:[#allocation2 + $0x92] sm:$0xff]  ;;  %v983_v21 = vld [vmem:[#allocation2 + $0x82] sm:$0xff] }
 0x10f   : > { %v860_v51 = vpop.f32.mrf.mxu0  ;;  %v706_v5 = vpop.f32.mrf.mxu1 }
 0x110   : > { %1028 = vst.msk [vmem:[#allocation2 + $0x2a] sm:$0xff] %vm263_vm1, %v1000_v20  ;;  %v1005_v25 = vadd.f32 %v977_v19, %v949_v22  ;;  %v947_v53 = vadd.f32 %v860_v51, %v691_v49  ;;  %v707_v57 = vadd.f32 %v706_v5, %v4368_v61 }
 0x111   : > { %v3460_v26 = vpop.f32.mrf.mxu0  ;;  %v3432_v15 = vpop.f32.mrf.mxu1 }
 0x112   : > { %1033 = vst.msk [vmem:[#allocation2 + $0x52] sm:$0xff] %vm263_vm1, %v1005_v25  ;;  %v1003_v30 = vadd.f32 %v975_v23, %v947_v53  ;;  %v950_v31 = vadd.f32 %v3460_v26, %v702_v24  ;;  %v718_v59 = vadd.f32 %v3432_v15, %v4372_v63  ;;  %v986_v25 = vld [vmem:[#allocation2 + $0x9a] sm:$0xff] }
 0x113   : > { %v863_v9 = vpop.f32.mrf.mxu0  ;;  %v709_v34 = vpop.f32.mrf.mxu1 }
 0x114   : > { %1031 = vst.msk [vmem:[#allocation2 + $0x42] sm:$0xff] %vm263_vm1, %v1003_v30  ;;  %v1006_v55 = vadd.f32 %v978_v28, %v950_v31  ;;  %v948_v35 = vadd.f32 %v863_v9, %v694_v29  ;;  %v984_v29 = vld [vmem:[#allocation2 + $0x8a] sm:$0xff] }
 0x115   : > { %v3463_v37 = vpop.f32.mrf.mxu0  ;;  %3666 = vmatmul.mubr.msk.bf16.gmra.mxu0 %vm416_vm0, %v4100_v27  ;;  %v3435_v43 = vpop.f32.mrf.mxu1  ;;  %v710_v27 = vadd.f32 %v709_v34, %v4374_v1 }
 0x116   : > { %1034 = vst.msk [vmem:[#allocation2 + $0x5a] sm:$0xff] %vm263_vm1, %v1006_v55  ;;  %v1004_v41 = vadd.f32 %v976_v17, %v948_v35  ;;  %v953_v60 = vadd.f32 %v3463_v37, %v715_v33  ;;  %v731_v12 = vadd.f32 %v3435_v43, %v4300_v36  ;;  %v989_v17 = vld [vmem:[#allocation2 + $0xb2] sm:$0xff]  ;;  %v987_v37 = vld [vmem:[#allocation2 + $0xa2] sm:$0xff] }
 0x117   : > { %v876_v62 = vpop.f32.mrf.mxu0  ;;  %v722_v2 = vpop.f32.mrf.mxu1 }
 0x118   : > { %1032 = vst.msk [vmem:[#allocation2 + $0x4a] sm:$0xff] %vm263_vm1, %v1004_v41  ;;  %v1009_v0 = vadd.f32 %v981_v39, %v953_v60  ;;  %v951_v3 = vadd.f32 %v876_v62, %v707_v57  ;;  %v723_v18 = vadd.f32 %v722_v2, %v4308_v38  ;;  %v990_v60 = vld [vmem:[#allocation2 + $0xba] sm:$0xff]  ;;  %v988_v2 = vld [vmem:[#allocation2 + $0xaa] sm:$0xff] }
 0x119   : > { %v3464_v4 = vpop.f32.mrf.mxu0  ;;  %v3436_v11 = vpop.f32.mrf.mxu1 }
 0x11a   : > { %1037 = vst.msk [vmem:[#allocation2 + $0x72] sm:$0xff] %vm263_vm1, %v1009_v0  ;;  %v1007_v61 = vadd.f32 %v979_v45, %v951_v3  ;;  %v954_v7 = vadd.f32 %v3464_v4, %v718_v59  ;;  %v734_v22 = vadd.f32 %v3436_v11, %v4310_v40 }
 0x11b   : > { %v879_v8 = vpop.f32.mrf.mxu0  ;;  %v725_v13 = vpop.f32.mrf.mxu1 }
 0x11c   : > { %1035 = vst.msk [vmem:[#allocation2 + $0x62] sm:$0xff] %vm263_vm1, %v1007_v61  ;;  %v1010_v63 = vadd.f32 %v982_v6, %v954_v7  ;;  %v952_v47 = vadd.f32 %v879_v8, %v710_v27  ;;  %v726_v5 = vadd.f32 %v725_v13, %v4312_v42  ;;  %v993_v61 = vld [vmem:[#allocation2 + $0xd2] sm:$0xff] }
 0x11d   : > { %v3467_v14 = vpop.f32.mrf.mxu0  ;;  %v3439_v19 = vpop.f32.mrf.mxu1 }
 0x11e   : > { %1038 = vst.msk [vmem:[#allocation2 + $0x7a] sm:$0xff] %vm263_vm1, %v1010_v63  ;;  %v1008_v1 = vadd.f32 %v980_v10, %v952_v47  ;;  %v957_v49 = vadd.f32 %v3467_v14, %v731_v12  ;;  %v747_v30 = vadd.f32 %v3439_v19, %v4316_v44  ;;  %v991_v12 = vld [vmem:[#allocation2 + $0xc2] sm:$0xff] }
 0x11f   : > { %v892_v20 = vpop.f32.mrf.mxu0  ;;  %v738_v51 = vpop.f32.mrf.mxu1 }
 0x120   : > { %1036 = vst.msk [vmem:[#allocation2 + $0x6a] sm:$0xff] %vm263_vm1, %v1008_v1  ;;  %v1013_v36 = vadd.f32 %v985_v16, %v957_v49  ;;  %v955_v23 = vadd.f32 %v892_v20, %v723_v18  ;;  %v739_v33 = vadd.f32 %v738_v51, %v4326_v46  ;;  %v994_v16 = vld [vmem:[#allocation2 + $0xda] sm:$0xff]  ;;  %v992_v20 = vld [vmem:[#allocation2 + $0xca] sm:$0xff] }
 0x121   : > { %v3468_v24 = vpop.f32.mrf.mxu0  ;;  %v3440_v53 = vpop.f32.mrf.mxu1 }
 0x122   : > { %1041 = vst.msk [vmem:[#allocation2 + $0x92] sm:$0xff] %vm263_vm1, %v1013_v36  ;;  %v1011_v38 = vadd.f32 %v983_v21, %v955_v23  ;;  %v958_v26 = vadd.f32 %v3468_v24, %v734_v22  ;;  %v750_v39 = vadd.f32 %v3440_v53, %v4330_v48 }
 0x123   : > { %v895_v28 = vpop.f32.mrf.mxu0  ;;  %v741_v15 = vpop.f32.mrf.mxu1 }
 0x124   : > { %1039 = vst.msk [vmem:[#allocation2 + $0x82] sm:$0xff] %vm263_vm1, %v1011_v38  ;;  %v1014_v40 = vadd.f32 %v986_v25, %v958_v26  ;;  %v956_v31 = vadd.f32 %v895_v28, %v726_v5  ;;  %v742_v62 = vadd.f32 %v741_v15, %v4334_v50 }
 0x125   : > { %v3471_v9 = vpop.f32.mrf.mxu0  ;;  %v3443_v55 = vpop.f32.mrf.mxu1 }
 0x126   : > { %1042 = vst.msk [vmem:[#allocation2 + $0x9a] sm:$0xff] %vm263_vm1, %v1014_v40  ;;  %v1012_v42 = vadd.f32 %v984_v29, %v956_v31  ;;  %v961_v34 = vadd.f32 %v3471_v9, %v747_v30  ;;  %v763_v3 = vadd.f32 %v3443_v55, %v4340_v52 }
 0x127   : > { %v908_v35 = vpop.f32.mrf.mxu0  ;;  %v754_v57 = vpop.f32.mrf.mxu1 }
 0x128   : > { %1040 = vst.msk [vmem:[#allocation2 + $0x8a] sm:$0xff] %vm263_vm1, %v1012_v42  ;;  %v1017_v44 = vadd.f32 %v989_v17, %v961_v34  ;;  %v959_v41 = vadd.f32 %v908_v35, %v739_v33  ;;  %v755_v11 = vadd.f32 %v754_v57, %v4350_v54 }
 0x129   : > { %v3472_v43 = vpop.f32.mrf.mxu0  ;;  %v3444_v45 = vpop.f32.mrf.mxu1 }
 0x12a   : > { %1045 = vst.msk [vmem:[#allocation2 + $0xb2] sm:$0xff] %vm263_vm1, %v1017_v44  ;;  %v1015_v46 = vadd.f32 %v987_v37, %v959_v41  ;;  %v962_v59 = vadd.f32 %v3472_v43, %v750_v39  ;;  %v766_v63 = vadd.f32 %v3444_v45, %v4354_v56 }
 0x12b   : > { %v911_v0 = vpop.f32.mrf.mxu0  ;;  %v757_v4 = vpop.f32.mrf.mxu1 }
 0x12c   : > { %1043 = vst.msk [vmem:[#allocation2 + $0xa2] sm:$0xff] %vm263_vm1, %v1015_v46  ;;  %v1018_v48 = vadd.f32 %v990_v60, %v962_v59  ;;  %v960_v6 = vadd.f32 %v911_v0, %v742_v62  ;;  %v758_v54 = vadd.f32 %v757_v4, %v4358_v58 }
 0x12d   : > { %v3475_v27 = vpop.f32.mrf.mxu0  ;;  %v4444_v8 = vpop.f32.mrf.mxu1 }
 0x12e   : > { %1046 = vst.msk [vmem:[#allocation2 + $0xba] sm:$0xff] %vm263_vm1, %v1018_v48  ;;  %v1016_v50 = vadd.f32 %v988_v2, %v960_v6  ;;  %v965_v7 = vadd.f32 %v3475_v27, %v763_v3 }
 0x12f   : > { %v924_v10 = vpop.f32.mrf.mxu0  ;;  %v4448_v47 = vpop.f32.mrf.mxu1 }
 0x130   : > { %1044 = vst.msk [vmem:[#allocation2 + $0xaa] sm:$0xff] %vm263_vm1, %v1016_v50  ;;  %v1021_v52 = vadd.f32 %v993_v61, %v965_v7  ;;  %v963_v13 = vadd.f32 %v924_v10, %v755_v11 }
 0x131   : > { %v3476_v14 = vpop.f32.mrf.mxu0  ;;  %v4452_v19 = vpop.f32.mrf.mxu1 }
 0x132   : > { %1049 = vst.msk [vmem:[#allocation2 + $0xd2] sm:$0xff] %vm263_vm1, %v1021_v52  ;;  %v1019_v18 = vadd.f32 %v991_v12, %v963_v13  ;;  %v966_v1 = vadd.f32 %v3476_v14, %v766_v63 }
 0x133   : > { %v927_v49 = vpop.f32.mrf.mxu0  ;;  %v4455_v22 = vpop.f32.mrf.mxu1 }
 0x134   : > { %1047 = vst.msk [vmem:[#allocation2 + $0xc2] sm:$0xff] %vm263_vm1, %v1019_v18  ;;  %v1022_v56 = vadd.f32 %v994_v16, %v966_v1  ;;  %v964_v21 = vadd.f32 %v927_v49, %v758_v54  ;;  %v1567_v49 = vld [vmem:[#allocation2 + $0x11] sm:$0xff] }
 0x135   : > { %v3515_v36 = vpop.f32.mrf.mxu0  ;;  %v4458_v23 = vpop.f32.mrf.mxu1 }
 0x136   : > { %1050 = vst.msk [vmem:[#allocation2 + $0xda] sm:$0xff] %vm263_vm1, %v1022_v56  ;;  %v1020_v51 = vadd.f32 %v992_v20, %v964_v21  ;;  %v1273_v13 = vadd.f32 %v3515_v36, %v4444_v8 }
 0x137   : > { %v1264_v58 = vpop.f32.mrf.mxu0  ;;  %v4461_v24 = vpop.f32.mrf.mxu1 }
 0x138   : > { %1048 = vst.msk [vmem:[#allocation2 + $0xca] sm:$0xff] %vm263_vm1, %v1020_v51  ;;  %v1265_v54 = vadd.f32 %v1264_v58, %v4448_v47  ;;  %v1568_v58 = vld [vmem:[#allocation2 + $0x19] sm:$0xff] }
 0x139   : > { %v3516_v25 = vpop.f32.mrf.mxu0  ;;  %v4463_v5 = vpop.f32.mrf.mxu1 }
 0x13a   : > { %v1276_v56 = vadd.f32 %v3516_v25, %v4452_v19 }
 0x13b   : > { %v1267_v38 = vpop.f32.mrf.mxu0  ;;  %v4465_v53 = vpop.f32.mrf.mxu1 }
 0x13c   : > { %v1268_v8 = vadd.f32 %v1267_v38, %v4455_v22 }
 0x13d   : > { %v3519_v26 = vpop.f32.mrf.mxu0  ;;  %v4467_v28 = vpop.f32.mrf.mxu1 }
 0x13f   : > { %v4469_v29 = vpop.f32.mrf.mxu0  ;;  %v4471_v30 = vpop.f32.mrf.mxu1 }
 0x140   : > { %v1281_v22 = vadd.f32 %v4469_v29, %v4461_v24 }
 0x141   : > { %v4473_v40 = vpop.f32.mrf.mxu0  ;;  %v4475_v15 = vpop.f32.mrf.mxu1 }
 0x143   : > { %v4477_v31 = vpop.f32.mrf.mxu0  ;;  %v4479_v9 = vpop.f32.mrf.mxu1 }
 0x144   : > { %v1284_v24 = vadd.f32 %v4477_v31, %v4465_v53 }
 0x145   : > { %v4481_v17 = vpop.f32.mrf.mxu0  ;;  %v4483_v33 = vpop.f32.mrf.mxu1 }
 0x147   : > { %v4485_v42 = vpop.f32.mrf.mxu0  ;;  %v4487_v55 = vpop.f32.mrf.mxu1 }
 0x148   : > { %v1297_v53 = vadd.f32 %v4485_v42, %v4471_v30 }
 0x149   : > { %v4489_v34 = vpop.f32.mrf.mxu0  ;;  %v4491_v35 = vpop.f32.mrf.mxu1 }
 0x14b   : > { %v4493_v37 = vpop.f32.mrf.mxu0  ;;  %v4495_v39 = vpop.f32.mrf.mxu1 }
 0x14c   : > { %v1300_v30 = vadd.f32 %v4493_v37, %v4479_v9 }
 0x14d   : > { %v4497_v44 = vpop.f32.mrf.mxu0  ;;  %v4499_v57 = vpop.f32.mrf.mxu1 }
 0x14f   : > { %v4501_v41 = vpop.f32.mrf.mxu0  ;;  %v4503_v43 = vpop.f32.mrf.mxu1 }
 0x150   : > { %v1313_v9 = vadd.f32 %v4501_v41, %v4487_v55 }
 0x151   : > { %v4505_v60 = vpop.f32.mrf.mxu0  ;;  %v4507_v62 = vpop.f32.mrf.mxu1 }
 0x153   : > { %v4509_v46 = vpop.f32.mrf.mxu0  ;;  %v4511_v45 = vpop.f32.mrf.mxu1 }
 0x154   : > { %v1316_v55 = vadd.f32 %v4509_v46, %v4495_v39 }
 0x155   : > { %v4513_v59 = vpop.f32.mrf.mxu0  ;;  %v4515_v0 = vpop.f32.mrf.mxu1 }
 0x157   : > { %v4517_v2 = vpop.f32.mrf.mxu0  ;;  %v4519_v3 = vpop.f32.mrf.mxu1 }
 0x158   : > { %v1329_v39 = vadd.f32 %v4517_v2, %v4503_v43 }
 0x159   : > { %v4521_v48 = vpop.f32.mrf.mxu0  ;;  %v4523_v4 = vpop.f32.mrf.mxu1 }
 0x15b   : > { %v4525_v6 = vpop.f32.mrf.mxu0  ;;  %v4527_v27 = vpop.f32.mrf.mxu1 }
 0x15c   : > { %v1332_v43 = vadd.f32 %v4525_v6, %v4511_v45 }
 0x15d   : > { %v4529_v61 = vpop.f32.mrf.mxu0  ;;  %v4531_v11 = vpop.f32.mrf.mxu1 }
 0x15f   : > { %v4533_v50 = vpop.f32.mrf.mxu0  ;;  %v4535_v7 = vpop.f32.mrf.mxu1 }
 0x160   : > { %5234 = vst [vmem:[#allocation6_spill] sm:$0xff] %v4535_v7  ;;  %v1345_v45 = vadd.f32 %v4533_v50, %v4519_v3 }
 0x161   : > { %v4537_v10 = vpop.f32.mrf.mxu0  ;;  %v4539_v12 = vpop.f32.mrf.mxu1 }
 0x162   : > { %5235 = vst [vmem:[#allocation7_spill] sm:$0xff] %v4539_v12  ;;  %v1565_v12 = vld [vmem:[#allocation2 + $0x1] sm:$0xff] }
 0x163   : > { %v4541_v63 = vpop.f32.mrf.mxu0  ;;  %v4543_v52 = vpop.f32.mrf.mxu1 }
 0x164   : > { %5236 = vst [vmem:[#allocation8_spill] sm:$0xff] %v4543_v52  ;;  %v1348_v3 = vadd.f32 %v4541_v63, %v4527_v27 }
 0x165   : > { %v4546_v14 = vpop.f32.mrf.mxu0  ;;  %v3547_v16 = vpop.f32.mrf.mxu1 }
 0x166   : > { %v1539_v18 = vadd.f32 %v3547_v16, %v1273_v13  ;;  %v1289_v16 = vadd.f32 %v3519_v26, %v4458_v23  ;;  %v1292_v23 = vadd.f32 %v4473_v40, %v4463_v5  ;;  %v1305_v5 = vadd.f32 %v4481_v17, %v4467_v28 }
 0x167   : > { %v4549_v1 = vpop.f32.mrf.mxu0  ;;  %v1426_v20 = vpop.f32.mrf.mxu1  ;;  %v1308_v28 = vadd.f32 %v4489_v34, %v4475_v15  ;;  %v1321_v15 = vadd.f32 %v4497_v44, %v4483_v33  ;;  %v1324_v33 = vadd.f32 %v4505_v60, %v4491_v35  ;;  %v1337_v35 = vadd.f32 %v4513_v59, %v4499_v57  ;;  %v5237_v27 = vld [vmem:[#allocation6_spill] sm:$0xff] }
 0x168   : > { %v1595_v21 = vadd.f32 %v1567_v49, %v1539_v18  ;;  %v1537_v51 = vadd.f32 %v1426_v20, %v1265_v54  ;;  %v1566_v18 = vld [vmem:[#allocation2 + $0x9] sm:$0xff]  ;;  %v1571_v20 = vld [vmem:[#allocation2 + $0x31] sm:$0xff]  ;;  %v1340_v57 = vadd.f32 %v4521_v48, %v4507_v62  ;;  %v1353_v62 = vadd.f32 %v4529_v61, %v4515_v0 }
 0x169   : > { %v4552_v32 = vpop.f32.mrf.mxu0  ;;  %v3548_v52 = vpop.f32.mrf.mxu1  ;;  %v1356_v0 = vadd.f32 %v4537_v10, %v4523_v4  ;;  %v1369_v4 = vadd.f32 %v4546_v14, %v4531_v11  ;;  %v1361_v63 = vadd.f32 %v4549_v1, %v5237_v27  ;;  %v5238_v11 = vld [vmem:[#allocation7_spill] sm:$0xff] }
 0x16a   : > { %1623 = vst.msk [vmem:[#allocation2 + $0x11] sm:$0xff] %vm263_vm1, %v1595_v21  ;;  %v1593_v36 = vadd.f32 %v1565_v12, %v1537_v51  ;;  %v1540_v7 = vadd.f32 %v3548_v52, %v1276_v56  ;;  %v1569_v51 = vld [vmem:[#allocation2 + $0x21] sm:$0xff]  ;;  %v1372_v14 = vadd.f32 %v4552_v32, %v5238_v11 }
 0x16b   : > { %v4556_v47 = vpop.f32.mrf.mxu0  ;;  %v1429_v13 = vpop.f32.mrf.mxu1  ;;  %v5239_v1 = vld [vmem:[#allocation8_spill] sm:$0xff] }
 0x16c   : > { %1621 = vst.msk [vmem:[#allocation2 + $0x1] sm:$0xff] %vm263_vm1, %v1593_v36  ;;  %v1596_v19 = vadd.f32 %v1568_v58, %v1540_v7  ;;  %v1538_v25 = vadd.f32 %v1429_v13, %v1268_v8  ;;  %v1572_v13 = vld [vmem:[#allocation2 + $0x39] sm:$0xff] }
 0x16d   : > { %v4560_v54 = vpop.f32.mrf.mxu0  ;;  %v3551_v49 = vpop.f32.mrf.mxu1 }
 0x16e   : > { %1624 = vst.msk [vmem:[#allocation2 + $0x19] sm:$0xff] %vm263_vm1, %v1596_v19  ;;  %v1594_v38 = vadd.f32 %v1566_v18, %v1538_v25  ;;  %v1543_v12 = vadd.f32 %v3551_v49, %v1289_v16  ;;  %v1570_v18 = vld [vmem:[#allocation2 + $0x29] sm:$0xff] }
 0x16f   : > { %v4565_v52 = vpop.f32.mrf.mxu0  ;;  %v1442_v56 = vpop.f32.mrf.mxu1 }
 0x170   : > { %1622 = vst.msk [vmem:[#allocation2 + $0x9] sm:$0xff] %vm263_vm1, %v1594_v38  ;;  %v1599_v26 = vadd.f32 %v1571_v20, %v1543_v12  ;;  %v1541_v7 = vadd.f32 %v1442_v56, %v1281_v22  ;;  %v1575_v12 = vld [vmem:[#allocation2 + $0x51] sm:$0xff] }
 0x171   : > { %v4570_v21 = vpop.f32.mrf.mxu0  ;;  %v3552_v8 = vpop.f32.mrf.mxu1 }
 0x172   : > { %1627 = vst.msk [vmem:[#allocation2 + $0x31] sm:$0xff] %vm263_vm1, %v1599_v26  ;;  %v1597_v29 = vadd.f32 %v1569_v51, %v1541_v7  ;;  %v1544_v36 = vadd.f32 %v3552_v8, %v1292_v23  ;;  %v1573_v26 = vld [vmem:[#allocation2 + $0x41] sm:$0xff] }
 0x173   : > { %v4575_v58 = vpop.f32.mrf.mxu0  ;;  %v1445_v16 = vpop.f32.mrf.mxu1 }
 0x174   : > { %1625 = vst.msk [vmem:[#allocation2 + $0x21] sm:$0xff] %vm263_vm1, %v1597_v29  ;;  %v1600_v40 = vadd.f32 %v1572_v13, %v1544_v36  ;;  %v1542_v19 = vadd.f32 %v1445_v16, %v1284_v24  ;;  %v1576_v24 = vld [vmem:[#allocation2 + $0x59] sm:$0xff]  ;;  %v1574_v16 = vld [vmem:[#allocation2 + $0x49] sm:$0xff] }
 0x175   : > { %v4580_v25 = vpop.f32.mrf.mxu0  ;;  %v3555_v49 = vpop.f32.mrf.mxu1 }
 0x176   : > { %1628 = vst.msk [vmem:[#allocation2 + $0x39] sm:$0xff] %vm263_vm1, %v1600_v40  ;;  %v1598_v31 = vadd.f32 %v1570_v18, %v1542_v19  ;;  %v1547_v22 = vadd.f32 %v3555_v49, %v1305_v5  ;;  %v1579_v18 = vld [vmem:[#allocation2 + $0x71] sm:$0xff] }
 0x177   : > { %v4585_v38 = vpop.f32.mrf.mxu0  ;;  %v1458_v20 = vpop.f32.mrf.mxu1 }
 0x178   : > { %1626 = vst.msk [vmem:[#allocation2 + $0x29] sm:$0xff] %vm263_vm1, %v1598_v31  ;;  %v1603_v17 = vadd.f32 %v1575_v12, %v1547_v22  ;;  %v1545_v56 = vadd.f32 %v1458_v20, %v1297_v53  ;;  %v1577_v22 = vld [vmem:[#allocation2 + $0x61] sm:$0xff] }
 0x179   : > { %v4590_v23 = vpop.f32.mrf.mxu0  ;;  %v3556_v7 = vpop.f32.mrf.mxu1 }
 0x17a   : > { %1631 = vst.msk [vmem:[#allocation2 + $0x51] sm:$0xff] %vm263_vm1, %v1603_v17  ;;  %v1601_v42 = vadd.f32 %v1573_v26, %v1545_v56  ;;  %v1548_v51 = vadd.f32 %v3556_v7, %v1308_v28  ;;  %v1580_v17 = vld [vmem:[#allocation2 + $0x79] sm:$0xff] }
 0x17b   : > { %v4595_v8 = vpop.f32.mrf.mxu0  ;;  %v1461_v29 = vpop.f32.mrf.mxu1 }
 0x17c   : > { %1629 = vst.msk [vmem:[#allocation2 + $0x41] sm:$0xff] %vm263_vm1, %v1601_v42  ;;  %v1604_v34 = vadd.f32 %v1576_v24, %v1548_v51  ;;  %v1546_v36 = vadd.f32 %v1461_v29, %v1300_v30  ;;  %v1578_v30 = vld [vmem:[#allocation2 + $0x69] sm:$0xff]  ;;  %v1583_v29 = vld [vmem:[#allocation2 + $0x91] sm:$0xff] }
 0x17d   : > { %v4600_v13 = vpop.f32.mrf.mxu0  ;;  %v3559_v5 = vpop.f32.mrf.mxu1 }
 0x17e   : > { %1632 = vst.msk [vmem:[#allocation2 + $0x59] sm:$0xff] %vm263_vm1, %v1604_v34  ;;  %v1602_v37 = vadd.f32 %v1574_v16, %v1546_v36  ;;  %v1551_v40 = vadd.f32 %v3559_v5, %v1321_v15  ;;  %v1581_v16 = vld [vmem:[#allocation2 + $0x81] sm:$0xff] }
 0x17f   : > { %v4605_v19 = vpop.f32.mrf.mxu0  ;;  %v1474_v49 = vpop.f32.mrf.mxu1 }
 0x180   : > { %1630 = vst.msk [vmem:[#allocation2 + $0x49] sm:$0xff] %vm263_vm1, %v1602_v37  ;;  %v1607_v44 = vadd.f32 %v1579_v18, %v1551_v40  ;;  %v1549_v53 = vadd.f32 %v1474_v49, %v1313_v9  ;;  %v1584_v40 = vld [vmem:[#allocation2 + $0x99] sm:$0xff] }
 0x181   : > { %v4610_v31 = vpop.f32.mrf.mxu0  ;;  %v3560_v12 = vpop.f32.mrf.mxu1 }
 0x182   : > { %1635 = vst.msk [vmem:[#allocation2 + $0x71] sm:$0xff] %vm263_vm1, %v1607_v44  ;;  %v1605_v41 = vadd.f32 %v1577_v22, %v1549_v53  ;;  %v1552_v20 = vadd.f32 %v3560_v12, %v1324_v33  ;;  %v1582_v44 = vld [vmem:[#allocation2 + $0x89] sm:$0xff] }
 0x183   : > { %v4615_v28 = vpop.f32.mrf.mxu0  ;;  %v1477_v56 = vpop.f32.mrf.mxu1 }
 0x184   : > { %1633 = vst.msk [vmem:[#allocation2 + $0x61] sm:$0xff] %vm263_vm1, %v1605_v41  ;;  %v1608_v60 = vadd.f32 %v1580_v17, %v1552_v20  ;;  %v1550_v26 = vadd.f32 %v1477_v56, %v1316_v55  ;;  %v1587_v55 = vld [vmem:[#allocation2 + $0xb1] sm:$0xff]  ;;  %v1585_v56 = vld [vmem:[#allocation2 + $0xa1] sm:$0xff] }
 0x185   : > { %v4620_v7 = vpop.f32.mrf.mxu0  ;;  %v3563_v42 = vpop.f32.mrf.mxu1 }
 0x186   : > { %1636 = vst.msk [vmem:[#allocation2 + $0x79] sm:$0xff] %vm263_vm1, %v1608_v60  ;;  %v1606_v46 = vadd.f32 %v1578_v30, %v1550_v26  ;;  %v1555_v51 = vadd.f32 %v3563_v42, %v1337_v35  ;;  %v1588_v30 = vld [vmem:[#allocation2 + $0xb9] sm:$0xff] }
 0x187   : > { %v4625_v24 = vpop.f32.mrf.mxu0  ;;  %v1490_v15 = vpop.f32.mrf.mxu1 }
 0x188   : > { %1634 = vst.msk [vmem:[#allocation2 + $0x69] sm:$0xff] %vm263_vm1, %v1606_v46  ;;  %v1611_v59 = vadd.f32 %v1583_v29, %v1555_v51  ;;  %v1553_v34 = vadd.f32 %v1490_v15, %v1329_v39  ;;  %v1586_v51 = vld [vmem:[#allocation2 + $0xa9] sm:$0xff] }
 0x189   : > { %v4630_v36 = vpop.f32.mrf.mxu0  ;;  %v3564_v5 = vpop.f32.mrf.mxu1 }
 0x18a   : > { %1639 = vst.msk [vmem:[#allocation2 + $0x91] sm:$0xff] %vm263_vm1, %v1611_v59  ;;  %v1609_v2 = vadd.f32 %v1581_v16, %v1553_v34  ;;  %v1556_v9 = vadd.f32 %v3564_v5, %v1340_v57  ;;  %v1591_v34 = vld [vmem:[#allocation2 + $0xd1] sm:$0xff] }
 0x18b   : > { %v4635_v37 = vpop.f32.mrf.mxu0  ;;  %v1493_v18 = vpop.f32.mrf.mxu1 }
 0x18c   : > { %1637 = vst.msk [vmem:[#allocation2 + $0x81] sm:$0xff] %vm263_vm1, %v1609_v2  ;;  %v1612_v48 = vadd.f32 %v1584_v40, %v1556_v9  ;;  %v1554_v49 = vadd.f32 %v1493_v18, %v1332_v43  ;;  %v1589_v9 = vld [vmem:[#allocation2 + $0xc1] sm:$0xff]  ;;  %v1364_v18 = vadd.f32 %v4556_v47, %v5239_v1 }
 0x18d   : > { %v4640_v33 = vpop.f32.mrf.mxu0  ;;  %v3567_v53 = vpop.f32.mrf.mxu1 }
 0x18e   : > { %1640 = vst.msk [vmem:[#allocation2 + $0x99] sm:$0xff] %vm263_vm1, %v1612_v48  ;;  %v1610_v6 = vadd.f32 %v1582_v44, %v1554_v49  ;;  %v1559_v22 = vadd.f32 %v3567_v53, %v1353_v62  ;;  %v1592_v44 = vld [vmem:[#allocation2 + $0xd9] sm:$0xff] }
 0x18f   : > { %v4645_v12 = vpop.f32.mrf.mxu0  ;;  %v1506_v41 = vpop.f32.mrf.mxu1 }
 0x190   : > { %1638 = vst.msk [vmem:[#allocation2 + $0x89] sm:$0xff] %vm263_vm1, %v1610_v6  ;;  %v1615_v61 = vadd.f32 %v1587_v55, %v1559_v22  ;;  %v1557_v20 = vadd.f32 %v1506_v41, %v1345_v45  ;;  %v1590_v22 = vld [vmem:[#allocation2 + $0xc9] sm:$0xff] }
 0x191   : > { %v4650_v17 = vpop.f32.mrf.mxu0  ;;  %v3568_v35 = vpop.f32.mrf.mxu1 }
 0x192   : > { %1643 = vst.msk [vmem:[#allocation2 + $0xb1] sm:$0xff] %vm263_vm1, %v1615_v61  ;;  %v1613_v50 = vadd.f32 %v1585_v56, %v1557_v20  ;;  %v1560_v60 = vadd.f32 %v3568_v35, %v1356_v0  ;;  %v2310_v20 = vlaneseq }
 0x193   : > { %v4655_v26 = vpop.f32.mrf.mxu0  ;;  %v1509_v42 = vpop.f32.mrf.mxu1 }
 0x194   : > { %1641 = vst.msk [vmem:[#allocation2 + $0xa1] sm:$0xff] %vm263_vm1, %v1613_v50  ;;  %v1616_v10 = vadd.f32 %v1588_v30, %v1560_v60  ;;  %v1558_v39 = vadd.f32 %v1509_v42, %v1348_v3  ;;  %v4689_v30 = vshrl.u32 %v2310_v20, 7 }
 0x195   : > { %v4660_v46 = vpop.f32.mrf.mxu0  ;;  %v3571_v29 = vpop.f32.mrf.mxu1 }
 0x196   : > { %1644 = vst.msk [vmem:[#allocation2 + $0xb9] sm:$0xff] %vm263_vm1, %v1616_v10  ;;  %v1614_v15 = vadd.f32 %v1586_v51, %v1558_v39  ;;  %v1563_v57 = vadd.f32 %v3571_v29, %v1369_v4  ;;  %v2165_v39 = vld [vmem:[#allocation2 + $0x10] sm:$0xff] }
 0x197   : > { %v4665_v59 = vpop.f32.mrf.mxu0  ;;  %v1522_v16 = vpop.f32.mrf.mxu1 }
 0x198   : > { %1642 = vst.msk [vmem:[#allocation2 + $0xa9] sm:$0xff] %vm263_vm1, %v1614_v15  ;;  %v1619_v5 = vadd.f32 %v1591_v34, %v1563_v57  ;;  %v1561_v43 = vadd.f32 %v1522_v16, %v1361_v63  ;;  %v2163_v57 = vld [vmem:[#allocation2] sm:$0xff]  ;;  %v2312_v16 = vadd.s32 8, %v4689_v30 }
 0x199   : > { %v4670_v2 = vpop.f32.mrf.mxu0  ;;  %v3572_v40 = vpop.f32.mrf.mxu1 }
 0x19a   : > { %1647 = vst.msk [vmem:[#allocation2 + $0xd1] sm:$0xff] %vm263_vm1, %v1619_v5  ;;  %v1617_v62 = vadd.f32 %v1589_v9, %v1561_v43  ;;  %v1564_v48 = vadd.f32 %v3572_v40, %v1372_v14  ;;  %v2166_v43 = vld [vmem:[#allocation2 + $0x18] sm:$0xff] }
 0x19b   : > { %v4675_v49 = vpop.f32.mrf.mxu0  ;;  %v1525_v53 = vpop.f32.mrf.mxu1 }
 0x19c   : > { %1645 = vst.msk [vmem:[#allocation2 + $0xc1] sm:$0xff] %vm263_vm1, %v1617_v62  ;;  %v1620_v32 = vadd.f32 %v1592_v44, %v1564_v48  ;;  %v1562_v45 = vadd.f32 %v1525_v53, %v1364_v18  ;;  %v2316_v62 = vadd.s32 40, %v4689_v30  ;;  %v2164_v48 = vld [vmem:[#allocation2 + $0x8] sm:$0xff]  ;;  %v2340_v44 = vand.u32 15, %v2312_v16  ;;  %v4722_v16 = vld [vmem:[%s5227_s2] ss:$0 sm:$0xff] }
 0x19d   : > { %v4678_v6 = vpop.f32.mrf.mxu0  ;;  %v3611_v55 = vpop.f32.mrf.mxu1 }
 0x19e   : > { %1648 = vst.msk [vmem:[#allocation2 + $0xd9] sm:$0xff] %vm263_vm1, %v1620_v32  ;;  %v1618_v41 = vadd.f32 %v1590_v22, %v1562_v45  ;;  %v1871_v3 = vadd.f32 %v3611_v55, %v4560_v54  ;;  %v2314_v54 = vadd.s32 24, %v4689_v30  ;;  %v2318_v32 = vadd.s32 56, %v4689_v30 }
 0x19f   : > { %v4681_v47 = vpop.f32.mrf.mxu0  ;;  %v1862_v0 = vpop.f32.mrf.mxu1  ;;  %v2320_v45 = vadd.s32 72, %v4689_v30  ;;  %vm4707_vm2 = vcmp.lt.s32.totalorder %v2340_v44, 14 }
 0x1a0   : > { %1646 = vst.msk [vmem:[#allocation2 + $0xc9] sm:$0xff] %vm263_vm1, %v1618_v41  ;;  %v1863_v42 = vadd.f32 %v1862_v0, %v4565_v52  ;;  %v2169_v0 = vld [vmem:[#allocation2 + $0x30] sm:$0xff] }
 0x1a1   : > { %v4684_v61 = vpop.f32.mrf.mxu0  ;;  %v3612_v56 = vpop.f32.mrf.mxu1 }
 0x1a2   : > { %v1874_v29 = vadd.f32 %v3612_v56, %v4570_v21  ;;  %v2322_v56 = vadd.s32 88, %v4689_v30 }
 0x1a3   : > { %v4686_v35 = vpop.f32.mrf.mxu0  ;;  %v1865_v50 = vpop.f32.mrf.mxu1 }
 0x1a4   : > { %v1866_v11 = vadd.f32 %v1865_v50, %v4575_v58  ;;  %v2342_v58 = vand.u32 15, %v2314_v54  ;;  %v2170_v54 = vld [vmem:[#allocation2 + $0x38] sm:$0xff] }
 0x1a5   : > { %v3643_v60 = vpop.f32.mrf.mxu0  ;;  %v3615_v4 = vpop.f32.mrf.mxu1 }
 0x1a6   : > { %v2137_v10 = vadd.f32 %v3643_v60, %v1871_v3  ;;  %v1887_v21 = vadd.f32 %v3615_v4, %v4580_v25  ;;  %v2344_v4 = vand.u32 15, %v2316_v62  ;;  %vm4711_vm3 = vcmp.lt.s32.totalorder %v2342_v58, 14  ;;  %v2168_v62 = vld [vmem:[#allocation2 + $0x28] sm:$0xff] }
 0x1a7   : > { %v2024_v51 = vpop.f32.mrf.mxu0  ;;  %v1878_v63 = vpop.f32.mrf.mxu1 }
 0x1a8   : > { %v2193_v27 = vadd.f32 %v2165_v39, %v2137_v10  ;;  %v2135_v15 = vadd.f32 %v2024_v51, %v1863_v42  ;;  %v1879_v22 = vadd.f32 %v1878_v63, %v4585_v38  ;;  %v2167_v10 = vld [vmem:[#allocation2 + $0x20] sm:$0xff]  ;;  %vm4726_vm5 = vcmp.lt.s32.totalorder %v2344_v4, 14 }
 0x1a9   : > { %v3644_v34 = vpop.f32.mrf.mxu0  ;;  %v3616_v14 = vpop.f32.mrf.mxu1 }
 0x1aa   : > { %2221 = vst.msk [vmem:[#allocation2 + $0x10] sm:$0xff] %vm263_vm1, %v2193_v27  ;;  %v2191_v52 = vadd.f32 %v2163_v57, %v2135_v15  ;;  %v2138_v5 = vadd.f32 %v3644_v34, %v1874_v29  ;;  %v1890_v3 = vadd.f32 %v3616_v14, %v4590_v23  ;;  %v2346_v29 = vand.u32 15, %v2318_v32 }
 0x1ab   : > { %v2027_v9 = vpop.f32.mrf.mxu0  ;;  %v1881_v1 = vpop.f32.mrf.mxu1  ;;  %v2348_v27 = vand.u32 15, %v2320_v45  ;;  %v2324_v34 = vadd.s32 104, %v4689_v30 }
 0x1ac   : > { %2219 = vst.msk [vmem:[#allocation2] sm:$0xff] %vm263_vm1, %v2191_v52  ;;  %v2194_v40 = vadd.f32 %v2166_v43, %v2138_v5  ;;  %v2136_v18 = vadd.f32 %v2027_v9, %v1866_v11  ;;  %v1882_v23 = vadd.f32 %v1881_v1, %v4595_v8  ;;  %v2350_v52 = vand.u32 15, %v2322_v56  ;;  %v2173_v56 = vld [vmem:[#allocation2 + $0x50] sm:$0xff] }
 0x1ad   : > { %v3647_v53 = vpop.f32.mrf.mxu0  ;;  %v3619_v55 = vpop.f32.mrf.mxu1  ;;  %vm4736_vm6 = vcmp.lt.s32.totalorder %v2346_v29, 14  ;;  %vm4740_vm7 = vcmp.lt.s32.totalorder %v2348_v27, 14  ;;  %v2326_v29 = vadd.s32 120, %v4689_v30  ;;  %v2328_v9 = vadd.s32 136, %v4689_v30 }
 0x1ae   : > { %2222 = vst.msk [vmem:[#allocation2 + $0x18] sm:$0xff] %vm263_vm1, %v2194_v40  ;;  %v2192_v25 = vadd.f32 %v2164_v48, %v2136_v18  ;;  %v2141_v41 = vadd.f32 %v3647_v53, %v1887_v21  ;;  %v1903_v14 = vadd.f32 %v3619_v55, %v4600_v13  ;;  %v5246_v40 = vmov 0.0  }
 0x1af   : > { %v2040_v20 = vpop.f32.mrf.mxu0  ;;  %v1894_v60 = vpop.f32.mrf.mxu1  ;;  %v3162_v1 = vsel %vm4707_vm2, 1.0, %v5246_v40  ;;  %v3163_v18 = vsel %vm4711_vm3, 1.0, %v5246_v40  ;;  %vm4760_vm8 = vcmp.lt.s32.totalorder %v2350_v52, 14  ;;  %vm2709_vm2 = vcmask 516096  }
 0x1b0   : > { %2220 = vst.msk [vmem:[#allocation2 + $0x8] sm:$0xff] %vm263_vm1, %v2192_v25  ;;  %v2197_v50 = vadd.f32 %v2169_v0, %v2141_v41  ;;  %v2139_v42 = vadd.f32 %v2040_v20, %v1879_v22  ;;  %v2352_v22 = vand.u32 15, %v2324_v34  ;;  %v1895_v41 = vadd.f32 %v1894_v60, %v4605_v19 }
 0x1b1   : > { %v3648_v51 = vpop.f32.mrf.mxu0  ;;  %v3620_v15 = vpop.f32.mrf.mxu1  ;;  %v4758_v20 = vsel %vm4726_vm5, 1.0, %v5246_v40 }
 0x1b2   : > { %2225 = vst.msk [vmem:[#allocation2 + $0x30] sm:$0xff] %vm263_vm1, %v2197_v50  ;;  %v2195_v63 = vadd.f32 %v2167_v10, %v2139_v42  ;;  %v2142_v57 = vadd.f32 %v3648_v51, %v1890_v3  ;;  %v1906_v0 = vadd.f32 %v3620_v15, %v4610_v31  ;;  %v4772_v10 = vsel %vm4736_vm6, 1.0, %v5246_v40 }
 0x1b3   : > { %v2043_v11 = vpop.f32.mrf.mxu0  ;;  %v1897_v5 = vpop.f32.mrf.mxu1  ;;  %v4777_v51 = vsel %vm4740_vm7, 1.0, %v5246_v40  ;;  %vm4785_vm9 = vcmp.lt.s32.totalorder %v2352_v22, 14  ;;  %v2354_v22 = vand.u32 15, %v2326_v29 }
 0x1b4   : > { %2223 = vst.msk [vmem:[#allocation2 + $0x20] sm:$0xff] %vm263_vm1, %v2195_v63  ;;  %v2198_v8 = vadd.f32 %v2170_v54, %v2142_v57  ;;  %v2140_v43 = vadd.f32 %v2043_v11, %v1882_v23  ;;  %v2171_v63 = vld [vmem:[#allocation2 + $0x40] sm:$0xff]  ;;  %v1898_v11 = vadd.f32 %v1897_v5, %v4615_v28 }
 0x1b5   : > { %v2249_v21 = vld [vmem:[#allocation2 + $0x12] sm:$0xff]  ;;  %v3651_v13 = vpop.f32.mrf.mxu0  ;;  %v3623_v32 = vpop.f32.mrf.mxu1  ;;  %vm4836_vm10 = vcmp.lt.s32.totalorder %v2354_v22, 14 }
 0x1b6   : > { %v4745_v53 = vadd.f32 %v4722_v16, %v2249_v21  ;;  %2226 = vst.msk [vmem:[#allocation2 + $0x38] sm:$0xff] %vm263_vm1, %v2198_v8  ;;  %v2196_v58 = vadd.f32 %v2168_v62, %v2140_v43  ;;  %v2145_v45 = vadd.f32 %v3651_v13, %v1903_v14  ;;  %v2174_v14 = vld [vmem:[#allocation2 + $0x58] sm:$0xff]  ;;  %v4793_v43 = vsel %vm4760_vm8, 1.0, %v5246_v40 }
 0x1b7   : > { %v2247_v25 = vld [vmem:[#allocation2 + $0x2] sm:$0xff]  ;;  %v2248_v55 = vld [vmem:[#allocation2 + $0xa] sm:$0xff]  ;;  %v2056_v3 = vpop.f32.mrf.mxu0  ;;  %v1910_v60 = vpop.f32.mrf.mxu1  ;;  %v1919_v5 = vadd.f32 %v3623_v32, %v4620_v7 }
 0x1b8   : > { %v3211_v42 = vpack.c.bf16 %v4745_v53, %v4745_v53  ;;  %v2282_v4 = vadd.f32 %v4722_v16, %v2247_v25  ;;  %v2283_v19 = vadd.f32 %v4722_v16, %v2248_v55  ;;  %2224 = vst.msk [vmem:[#allocation2 + $0x28] sm:$0xff] %vm263_vm1, %v2196_v58  ;;  %v2201_v31 = vadd.f32 %v2173_v56, %v2145_v45  ;;  %v2172_v7 = vld [vmem:[#allocation2 + $0x48] sm:$0xff] }
 0x1b9   : > { %v2143_v38 = vadd.f32 %v2056_v3, %v1895_v41  ;;  %v3652_v39 = vpop.f32.mrf.mxu0  ;;  %v4783_v15 = vpop.f32.mrf.mxu1  ;;  %v4806_v45 = vsel %vm4785_vm9, 1.0, %v5246_v40  ;;  %v1911_v29 = vadd.f32 %v1910_v60, %v4625_v24 }
 0x1ba   : > { %2594 = vst.msk [vmem:[%s4751_s29 + $0x8] sm:$0xf] %vm2591_vm4, %v3211_v42  ;;  %v2452_v27 = vmul.f32 %v3162_v1, %v2283_v19  ;;  %v3209_v23 = vpack.c.bf16 %v2282_v4, %v2282_v4  ;;  %v2146_v57 = vadd.f32 %v3652_v39, %v1906_v0  ;;  %v4817_v19 = vadd.s32 152, %v4689_v30 }
 0x1bb   : > { %2229 = vst.msk [vmem:[#allocation2 + $0x50] sm:$0xff] %vm263_vm1, %v2201_v31  ;;  %v2250_v54 = vld [vmem:[#allocation2 + $0x1a] sm:$0xff]  ;;  %v2199_v52 = vadd.f32 %v2171_v63, %v2143_v38  ;;  %v2059_v8 = vpop.f32.mrf.mxu0  ;;  %v4799_v48 = vpop.f32.mrf.mxu1  ;;  %v2356_v31 = vand.u32 15, %v2328_v9 }
 0x1bc   : > { %v2479_v21 = vpack.c.bf16 %v2452_v27, %v2282_v4  ;;  %v3210_v1 = vpack.c.bf16 %v2452_v27, %v2452_v27  ;;  %2592 = vst.msk [vmem:[%s4751_s29] sm:$0xf] %vm2591_vm4, %v3209_v23  ;;  %v2285_v62 = vadd.f32 %v4722_v16, %v2250_v54  ;;  %v2202_v13 = vadd.f32 %v2174_v14, %v2146_v57  ;;  %v2177_v14 = vld [vmem:[#allocation2 + $0x70] sm:$0xff] }
 0x1bd   : > { %v2253_v28 = vld [vmem:[#allocation2 + $0x32] sm:$0xff]  ;;  %2227 = vst.msk [vmem:[#allocation2 + $0x40] sm:$0xff] %vm263_vm1, %v2199_v52  ;;  %v2144_v44 = vadd.f32 %v2059_v8, %v1898_v11  ;;  %v3655_v58 = vpop.f32.mrf.mxu0  ;;  %v4814_v32 = vpop.f32.mrf.mxu1  ;;  %vm4846_vm11 = vcmp.lt.s32.totalorder %v2356_v31, 14 }
 0x1be   : > { %2593 = vst.msk [vmem:[%s4751_s29 + $0x4] sm:$0xf] %vm2591_vm4, %v3210_v1  ;;  %v2620_v25 = vunpack.c.l.bf16 %v2479_v21  ;;  %v2621_v55 = vunpack.c.h.bf16 %v2479_v21  ;;  %v2454_v41 = vmul.f32 %v3163_v18, %v2285_v62  ;;  %v4811_v0 = vadd.f32 %v4722_v16, %v2253_v28 }
 0x1bf   : > { %2230 = vst.msk [vmem:[#allocation2 + $0x58] sm:$0xff] %vm263_vm1, %v2202_v13  ;;  %v2251_v56 = vld [vmem:[#allocation2 + $0x22] sm:$0xff]  ;;  %v2252_v3 = vld [vmem:[#allocation2 + $0x2a] sm:$0xff]  ;;  %v2200_v50 = vadd.f32 %v2172_v7, %v2144_v44  ;;  %v2149_v42 = vadd.f32 %v3655_v58, %v1919_v5  ;;  %v2072_v4 = vpop.f32.mrf.mxu0  ;;  %v4821_v27 = vpop.f32.mrf.mxu1  ;;  %v2336_v13 = vadd.s32 200, %v4689_v30 }
 0x1c0   : > { %v2648_v38 = vsel %vm263_vm1, %v2620_v25, 0.0  ;;  %v2711_v18 = vmul.f32 %v2620_v25, %v2620_v25  ;;  %v2712_v39 = vmul.f32 %v2621_v55, %v2621_v55  ;;  %v2649_v23 = vsel %vm263_vm1, %v2621_v55, 0.0 }
 0x1c1   : > { %v2480_v63 = vpack.c.bf16 %v2454_v41, %v4745_v53  ;;  %v3212_v57 = vpack.c.bf16 %v2454_v41, %v2454_v41  ;;  %v3215_v34 = vpack.c.bf16 %v4811_v0, %v4811_v0  ;;  %2228 = vst.msk [vmem:[#allocation2 + $0x48] sm:$0xff] %vm263_vm1, %v2200_v50  ;;  %v4828_v54 = vpop.f32.mrf.mxu0  ;;  %v2286_v24 = vadd.f32 %v4722_v16, %v2251_v56  ;;  %v4834_v8 = vpop.f32.mrf.mxu1 }
 0x1c2   : > { %v2739_v11 = vsel %vm263_vm1, %v2711_v18, 0.0  ;;  %v2740_v52 = vsel %vm263_vm1, %v2712_v39, 0.0  ;;  %v2287_v60 = vadd.f32 %v4722_v16, %v2252_v3  ;;  %v2205_v1 = vadd.f32 %v2177_v14, %v2149_v42 }
 0x1c3   : > { %2595 = vst.msk [vmem:[%s4751_s29 + $0xc] sm:$0xf] %vm2591_vm4, %v3212_v57  ;;  %v2622_v9 = vunpack.c.l.bf16 %v2480_v63  ;;  %v2623_v21 = vunpack.c.h.bf16 %v2480_v63  ;;  %2598 = vst.msk [vmem:[%s4751_s29 + $0x18] sm:$0xf] %vm2591_vm4, %v3215_v34  ;;  %v4844_v62 = vpop.f32.mrf.mxu0  ;;  %v2650_v28 = vadd.f32 %v2649_v23, %v2648_v38  ;;  %v3213_v44 = vpack.c.bf16 %v2286_v24, %v2286_v24  ;;  %v4851_v25 = vpop.f32.mrf.mxu1 }
 0x1c4   : > { %v2456_v5 = vmul.f32 %v4758_v20, %v2287_v60  ;;  %v2254_v58 = vld [vmem:[#allocation2 + $0x3a] sm:$0xff]  ;;  %v2147_v22 = vadd.f32 %v2072_v4, %v1911_v29  ;;  %v2741_v55 = vadd.f32 %v2740_v52, %v2739_v11  ;;  %2233 = vst.msk [vmem:[#allocation2 + $0x70] sm:$0xff] %vm263_vm1, %v2205_v1 }
 0x1c5   : > { %v2651_v41 = vsel %vm263_vm1, %v2622_v9, 0.0  ;;  %v2713_v7 = vmul.f32 %v2622_v9, %v2622_v9  ;;  %v2714_v56 = vmul.f32 %v2623_v21, %v2623_v21  ;;  %v4855_v50 = vpop.f32.mrf.mxu0  ;;  %2596 = vst.msk [vmem:[%s4751_s29 + $0x10] sm:$0xf] %vm2591_vm4, %v3213_v44  ;;  %v2289_v20 = vadd.f32 %v4722_v16, %v2254_v58  ;;  %v2175_v4 = vld [vmem:[#allocation2 + $0x60] sm:$0xff]  ;;  %v4860_v18 = vpop.f32.mrf.mxu1 }
 0x1c6   : > { %v2257_v3 = vld [vmem:[#allocation2 + $0x52] sm:$0xff]  ;;  %v2652_v42 = vadd.f32 %v2651_v41, %v2650_v28  ;;  %v2481_v31 = vpack.c.bf16 %v2456_v5, %v2286_v24  ;;  %v3214_v38 = vpack.c.bf16 %v2456_v5, %v2456_v5  ;;  %v2653_v39 = vsel %vm263_vm1, %v2623_v21, 0.0 }
 0x1c7   : > { %v2742_v29 = vsel %vm263_vm1, %v2713_v7, 0.0  ;;  %v4865_v23 = vadd.f32 %v4722_v16, %v2257_v3  ;;  %v2203_v63 = vadd.f32 %v2175_v4, %v2147_v22  ;;  %v4867_v57 = vpop.f32.mrf.mxu0  ;;  %v4871_v14 = vpop.f32.mrf.mxu1  ;;  %v2358_v9 = vand.u32 15, %v4817_v19 }
 0x1c8   : > { %v2743_v34 = vadd.f32 %v2742_v29, %v2741_v55  ;;  %2597 = vst.msk [vmem:[%s4751_s29 + $0x14] sm:$0xf] %vm2591_vm4, %v3214_v38  ;;  %v2624_v11 = vunpack.c.l.bf16 %v2481_v31  ;;  %v2654_v52 = vadd.f32 %v2653_v39, %v2652_v42  ;;  %v2255_v24 = vld [vmem:[#allocation2 + $0x42] sm:$0xff]  ;;  %v2256_v60 = vld [vmem:[#allocation2 + $0x4a] sm:$0xff]  ;;  %v2458_v21 = vmul.f32 %v4772_v10, %v2289_v20 }
 0x1c9   : > { %v3219_v1 = vpack.c.bf16 %v4865_v23, %v4865_v23  ;;  %v2290_v28 = vadd.f32 %v4722_v16, %v2255_v24  ;;  %v2291_v5 = vadd.f32 %v4722_v16, %v2256_v60  ;;  %2231 = vst.msk [vmem:[#allocation2 + $0x60] sm:$0xff] %vm263_vm1, %v2203_v63  ;;  %v4880_v44 = vpop.f32.mrf.mxu0  ;;  %v2744_v58 = vsel %vm263_vm1, %v2714_v56, 0.0  ;;  %v4884_v41 = vpop.f32.mrf.mxu1 }
 0x1ca   : > { %v2625_v22 = vunpack.c.h.bf16 %v2481_v31  ;;  %v2655_v19 = vsel %vm263_vm1, %v2624_v11, 0.0  ;;  %v2715_v55 = vmul.f32 %v2624_v11, %v2624_v11  ;;  %v2745_v10 = vadd.f32 %v2744_v58, %v2743_v34 }
 0x1cb   : > { %v2482_v7 = vpack.c.bf16 %v2458_v21, %v4811_v0  ;;  %v3216_v3 = vpack.c.bf16 %v2458_v21, %v2458_v21  ;;  %v1922_v42 = vadd.f32 %v4783_v15, %v4630_v36  ;;  %2602 = vst.msk [vmem:[%s4751_s29 + $0x28] sm:$0xf] %vm2591_vm4, %v3219_v1  ;;  %v4891_v38 = vpop.f32.mrf.mxu0  ;;  %v2656_v56 = vadd.f32 %v2655_v19, %v2654_v52  ;;  %v4895_v39 = vpop.f32.mrf.mxu1 }
 0x1cc   : > { %v2746_v31 = vsel %vm263_vm1, %v2715_v55, 0.0  ;;  %v2460_v20 = vmul.f32 %v4777_v51, %v2291_v5  ;;  %v3217_v4 = vpack.c.bf16 %v2290_v28, %v2290_v28  ;;  %v4902_v36 = vsel %vm4836_vm10, 1.0, %v5246_v40  ;;  %v2178_v55 = vld [vmem:[#allocation2 + $0x78] sm:$0xff] }
 0x1cd   : > { %2599 = vst.msk [vmem:[%s4751_s29 + $0x1c] sm:$0xf] %vm2591_vm4, %v3216_v3  ;;  %v2626_v0 = vunpack.c.l.bf16 %v2482_v7  ;;  %v4904_v15 = vpop.f32.mrf.mxu0  ;;  %v4907_v29 = vadd.s32 168, %v4689_v30  ;;  %v4912_v51 = vsel %vm4846_vm11, 1.0, %v5246_v40  ;;  %v2716_v63 = vmul.f32 %v2625_v22, %v2625_v22  ;;  %v4917_v53 = vpop.f32.mrf.mxu1  ;;  %v2181_v3 = vld [vmem:[#allocation2 + $0x90] sm:$0xff] }
 0x1ce   : > { %v3218_v34 = vpack.c.bf16 %v2460_v20, %v2460_v20  ;;  %2600 = vst.msk [vmem:[%s4751_s29 + $0x20] sm:$0xf] %vm2591_vm4, %v3217_v4  ;;  %v2150_v11 = vadd.f32 %v4828_v54, %v1922_v42  ;;  %v2334_v52 = vadd.s32 184, %v4689_v30  ;;  %v2657_v24 = vsel %vm263_vm1, %v2625_v22, 0.0 }
 0x1cf   : > { %v2747_v60 = vadd.f32 %v2746_v31, %v2745_v10  ;;  %v4921_v21 = vpop.f32.mrf.mxu0  ;;  %v4925_v1 = vadd.s32 216, %v4689_v30  ;;  %v2658_v5 = vadd.f32 %v2657_v24, %v2656_v56  ;;  %v2717_v58 = vmul.f32 %v2626_v0, %v2626_v0  ;;  %v1958_v31 = vpop.f32.mrf.mxu1 }
 0x1d0   : > { %v4927_v19 = vpack.c.bf16 %v2460_v20, %v2290_v28  ;;  %2601 = vst.msk [vmem:[%s4751_s29 + $0x24] sm:$0xf] %vm2591_vm4, %v3218_v34  ;;  %v2258_v54 = vld [vmem:[#allocation2 + $0x5a] sm:$0xff]  ;;  %vm4931_vm12 = vcmp.lt.s32.totalorder %v2358_v9, 14  ;;  %v2659_v22 = vsel %vm263_vm1, %v2626_v0, 0.0  ;;  %v2206_v42 = vadd.f32 %v2178_v55, %v2150_v11 }
 0x1d1   : > { %v2293_v10 = vadd.f32 %v4722_v16, %v2258_v54  ;;  %v4937_v30 = vpop.f32.mrf.mxu0  ;;  %v2360_v56 = vand.u32 15, %v4907_v29  ;;  %v2748_v28 = vsel %vm263_vm1, %v2716_v63, 0.0  ;;  %v2627_v20 = vunpack.c.h.bf16 %v2482_v7 }
 0x1d2   : > { %v1914_v4 = vadd.f32 %v4799_v48, %v4635_v37  ;;  %v2362_v9 = vand.u32 15, %v2334_v52  ;;  %v2749_v34 = vadd.f32 %v2748_v28, %v2747_v60  ;;  %v1935_v24 = vadd.f32 %v4814_v32, %v4640_v33  ;;  %2234 = vst.msk [vmem:[#allocation2 + $0x78] sm:$0xff] %vm263_vm1, %v2206_v42  ;;  %v2176_v48 = vld [vmem:[#allocation2 + $0x68] sm:$0xff]  ;;  %v3636_v32 = vpop.f32.mrf.mxu1 }
 0x1d3   : > { %v4946_v0 = vmul.f32 %v4793_v43, %v2293_v10  ;;  %v4949_v11 = vpop.f32.mrf.mxu0  ;;  %v2364_v54 = vand.u32 15, %v2336_v13  ;;  %v2660_v29 = vadd.f32 %v2659_v22, %v2658_v5  ;;  %v2750_v63 = vsel %vm263_vm1, %v2717_v58, 0.0 }
 0x1d4   : > { %v4953_v7 = vunpack.c.l.bf16 %v4927_v19  ;;  %v2148_v37 = vadd.f32 %v4844_v62, %v1914_v4  ;;  %v1927_v33 = vadd.f32 %v4821_v27, %v4645_v12  ;;  %v2366_v60 = vand.u32 15, %v4925_v1 }
 0x1d5   : > { %v3220_v43 = vpack.c.bf16 %v4946_v0, %v4946_v0  ;;  %v3667_v52 = vpop.f32.mrf.mxu0  ;;  %v4964_v13 = vsel %vm4931_vm12, 1.0, %v5246_v40  ;;  %v2661_v5 = vsel %vm263_vm1, %v2627_v20, 0.0  ;;  %v1938_v62 = vadd.f32 %v4834_v8, %v4650_v17 }
 0x1d6   : > { %v2204_v58 = vadd.f32 %v2176_v48, %v2148_v37  ;;  %v2153_v12 = vadd.f32 %v4855_v50, %v1935_v24  ;;  %v4970_v27 = vmul.f32 %v2627_v20, %v2627_v20  ;;  %v4972_v55 = vadd.f32 %v2750_v63, %v2749_v34  ;;  %v2179_v50 = vld [vmem:[#allocation2 + $0x80] sm:$0xff]  ;;  %v2182_v24 = vld [vmem:[#allocation2 + $0x98] sm:$0xff] }
 0x1d7   : > { %2603 = vst.msk [vmem:[%s4751_s29 + $0x2c] sm:$0xf] %vm2591_vm4, %v3220_v43  ;;  %v1930_v1 = vadd.f32 %v4851_v25, %v4655_v26  ;;  %v2151_v22 = vadd.f32 %v4867_v57, %v1927_v33  ;;  %v2120_v10 = vpop.f32.mrf.mxu0  ;;  %v4979_v42 = vadd.f32 %v2661_v5, %v2660_v29  ;;  %v4983_v17 = vsel %vm263_vm1, %v4953_v7, 0.0 }
 0x1d8   : > { %2232 = vst.msk [vmem:[#allocation2 + $0x68] sm:$0xff] %vm263_vm1, %v2204_v58  ;;  %v2209_v8 = vadd.f32 %v2181_v3, %v2153_v12  ;;  %v2154_v28 = vadd.f32 %v4880_v44, %v1938_v62  ;;  %vm4987_vm13 = vcmp.lt.s32.totalorder %v2360_v56, 14  ;;  %vm4991_vm14 = vcmp.lt.s32.totalorder %v2362_v9, 14  ;;  %v1961_v44 = vpop.f32.mrf.mxu1  ;;  %v2184_v62 = vld [vmem:[#allocation2 + $0xa8] sm:$0xff] }
 0x1d9   : > { %v1951_v25 = vadd.f32 %v4860_v18, %v4660_v46  ;;  %v1943_v57 = vadd.f32 %v4871_v14, %v4665_v59  ;;  %v2207_v4 = vadd.f32 %v2179_v50, %v2151_v22  ;;  %v1954_v34 = vadd.f32 %v4884_v41, %v4670_v2  ;;  %v3668_v56 = vpop.f32.mrf.mxu0  ;;  %v2261_v9 = vld [vmem:[#allocation2 + $0x72] sm:$0xff]  ;;  %v2180_v41 = vld [vmem:[#allocation2 + $0x88] sm:$0xff] }
 0x1da   : > { %vm5001_vm15 = vcmp.lt.s32.totalorder %v2364_v54, 14  ;;  %2237 = vst.msk [vmem:[#allocation2 + $0x90] sm:$0xff] %vm263_vm1, %v2209_v8  ;;  %v2210_v63 = vadd.f32 %v2182_v24, %v2154_v28  ;;  %v1946_v46 = vadd.f32 %v4895_v39, %v4675_v49  ;;  %v2152_v59 = vadd.f32 %v4891_v38, %v1930_v1  ;;  %v2183_v39 = vld [vmem:[#allocation2 + $0xa0] sm:$0xff]  ;;  %v2189_v22 = vld [vmem:[#allocation2 + $0xd0] sm:$0xff] }
 0x1db   : > { %v1967_v18 = vadd.f32 %v4917_v53, %v4678_v6  ;;  %vm5011_vm0 = vcmp.lt.s32.totalorder %v2366_v60, 14  ;;  %v5016_v14 = vadd.f32 %v4722_v16, %v2261_v9  ;;  %2235 = vst.msk [vmem:[#allocation2 + $0x80] sm:$0xff] %vm263_vm1, %v2207_v4  ;;  %v2157_v54 = vadd.f32 %v4904_v15, %v1951_v25  ;;  %v2185_v6 = vld [vmem:[#allocation2 + $0xb0] sm:$0xff]  ;;  %v2123_v48 = vpop.f32.mrf.mxu0 }
 0x1dc   : > { %v1959_v37 = vadd.f32 %v1958_v31, %v4681_v47  ;;  %v2155_v49 = vadd.f32 %v4921_v21, %v1943_v57  ;;  %2238 = vst.msk [vmem:[#allocation2 + $0x98] sm:$0xff] %vm263_vm1, %v2210_v63  ;;  %v2208_v38 = vadd.f32 %v2180_v41, %v2152_v59  ;;  %v1970_v53 = vadd.f32 %v3636_v32, %v4684_v61  ;;  %v2186_v31 = vld [vmem:[#allocation2 + $0xb8] sm:$0xff]  ;;  %v2187_v32 = vld [vmem:[#allocation2 + $0xc0] sm:$0xff] }
 0x1dd   : > { %v2158_v33 = vadd.f32 %v4937_v30, %v1954_v34  ;;  %v1962_v43 = vadd.f32 %v1961_v44, %v4686_v35  ;;  %v3223_v15 = vpack.c.bf16 %v5016_v14, %v5016_v14  ;;  %v2213_v60 = vadd.f32 %v2185_v6, %v2157_v54 }
 0x1de   : > { %v2211_v47 = vadd.f32 %v2183_v39, %v2155_v49  ;;  %v2156_v21 = vadd.f32 %v4949_v11, %v1946_v46  ;;  %2236 = vst.msk [vmem:[#allocation2 + $0x88] sm:$0xff] %vm263_vm1, %v2208_v38  ;;  %v2161_v58 = vadd.f32 %v3667_v52, %v1967_v18  ;;  %v2159_v61 = vadd.f32 %v2120_v10, %v1959_v37 }
 0x1df   : > { %v2214_v5 = vadd.f32 %v2186_v31, %v2158_v33  ;;  %v2162_v30 = vadd.f32 %v3668_v56, %v1970_v53  ;;  %v2719_v35 = vmul.f32 %v4953_v7, %v4953_v7  ;;  %v2484_v12 = vpack.c.bf16 %v4946_v0, %v4865_v23  ;;  %2606 = vst.msk [vmem:[%s4751_s29 + $0x38] sm:$0xf] %vm2591_vm4, %v3223_v15  ;;  %v2259_v1 = vld [vmem:[#allocation2 + $0x62] sm:$0xff]  ;;  %v2260_v3 = vld [vmem:[#allocation2 + $0x6a] sm:$0xff]  ;;  %v2190_v23 = vld [vmem:[#allocation2 + $0xd8] sm:$0xff] }
 0x1e0   : > { %2241 = vst.msk [vmem:[#allocation2 + $0xb0] sm:$0xff] %vm263_vm1, %v2213_v60  ;;  %2239 = vst.msk [vmem:[#allocation2 + $0xa0] sm:$0xff] %vm263_vm1, %v2211_v47  ;;  %v2212_v11 = vadd.f32 %v2184_v62, %v2156_v21  ;;  %v2160_v52 = vadd.f32 %v2123_v48, %v1962_v43  ;;  %v2294_v10 = vadd.f32 %v4722_v16, %v2259_v1  ;;  %v2188_v0 = vld [vmem:[#allocation2 + $0xc8] sm:$0xff]  ;;  %v2752_v28 = vsel %vm263_vm1, %v4970_v27, 0.0 }
 0x1e1   : > { %v2295_v8 = vadd.f32 %v4722_v16, %v2260_v3  ;;  %2242 = vst.msk [vmem:[#allocation2 + $0xb8] sm:$0xff] %vm263_vm1, %v2214_v5  ;;  %v2217_v7 = vadd.f32 %v2189_v22, %v2161_v58  ;;  %v2215_v50 = vadd.f32 %v2187_v32, %v2159_v61  ;;  %v2629_v25 = vunpack.c.h.bf16 %v4927_v19 }
 0x1e2   : > { %2240 = vst.msk [vmem:[#allocation2 + $0xa8] sm:$0xff] %vm263_vm1, %v2212_v11  ;;  %v2218_v57 = vadd.f32 %v2190_v23, %v2162_v30  ;;  %v2216_v4 = vadd.f32 %v2188_v0, %v2160_v52  ;;  %v2664_v34 = vadd.f32 %v4983_v17, %v4979_v42  ;;  %v2753_v24 = vadd.f32 %v2752_v28, %v4972_v55  ;;  %v2262_v9 = vld [vmem:[#allocation2 + $0x7a] sm:$0xff] }
 0x1e3   : > { %v2464_v44 = vmul.f32 %v4806_v45, %v2295_v8  ;;  %v3221_v56 = vpack.c.bf16 %v2294_v10, %v2294_v10  ;;  %2245 = vst.msk [vmem:[#allocation2 + $0xd0] sm:$0xff] %vm263_vm1, %v2217_v7  ;;  %2243 = vst.msk [vmem:[#allocation2 + $0xc0] sm:$0xff] %vm263_vm1, %v2215_v50  ;;  %v2754_v19 = vsel %vm263_vm1, %v2719_v35, 0.0  ;;  %v2297_v27 = vadd.f32 %v4722_v16, %v2262_v9  ;;  %v2265_v42 = vld [vmem:[#allocation2 + $0x92] sm:$0xff] }
 0x1e4   : > { %2246 = vst.msk [vmem:[#allocation2 + $0xd8] sm:$0xff] %vm263_vm1, %v2218_v57  ;;  %2244 = vst.msk [vmem:[#allocation2 + $0xc8] sm:$0xff] %vm263_vm1, %v2216_v4  ;;  %v3172_v45 = vsel %vm4987_vm13, 1.0, %v5246_v40  ;;  %v3173_v55 = vsel %vm4991_vm14, 1.0, %v5246_v40  ;;  %v2630_v17 = vunpack.c.l.bf16 %v2484_v12  ;;  %v5064_v46 = vadd.f32 %v4722_v16, %v2265_v42 }
 0x1e5   : > { %v3222_v63 = vpack.c.bf16 %v2464_v44, %v2464_v44  ;;  %2604 = vst.msk [vmem:[%s4751_s29 + $0x30] sm:$0xf] %vm2591_vm4, %v3221_v56  ;;  %v3174_v59 = vsel %vm5001_vm15, 1.0, %v5246_v40  ;;  %v2665_v18 = vsel %vm263_vm1, %v2629_v25, 0.0  ;;  %v2720_v20 = vmul.f32 %v2629_v25, %v2629_v25  ;;  %v2263_v54 = vld [vmem:[#allocation2 + $0x82] sm:$0xff]  ;;  %v2264_v37 = vld [vmem:[#allocation2 + $0x8a] sm:$0xff] }
 0x1e6   : > { %v2466_v41 = vmul.f32 %v4902_v36, %v2297_v27  ;;  %v3175_v26 = vsel %vm5011_vm0, 1.0, %v5246_v40  ;;  %v2666_v49 = vadd.f32 %v2665_v18, %v2664_v34  ;;  %v2755_v38 = vadd.f32 %v2754_v19, %v2753_v24 }
 0x1e7   : > { %2605 = vst.msk [vmem:[%s4751_s29 + $0x34] sm:$0xf] %vm2591_vm4, %v3222_v63  ;;  %v2298_v6 = vadd.f32 %v4722_v16, %v2263_v54  ;;  %v2299_v29 = vadd.f32 %v4722_v16, %v2264_v37  ;;  %v2266_v39 = vld [vmem:[#allocation2 + $0x9a] sm:$0xff]  ;;  %v5078_v53 = vunpack.c.h.bf16 %v2484_v12  ;;  %v3227_v40 = vpack.c.bf16 %v5064_v46, %v5064_v46 }
 0x1e8   : > { %v3224_v33 = vpack.c.bf16 %v2466_v41, %v2466_v41  ;;  %v2269_v36 = vld [vmem:[#allocation2 + $0xb2] sm:$0xff]  ;;  %v2301_v43 = vadd.f32 %v4722_v16, %v2266_v39  ;;  %v2667_v2 = vsel %vm263_vm1, %v2630_v17, 0.0  ;;  %v2721_v21 = vmul.f32 %v2630_v17, %v2630_v17 }
 0x1e9   : > { %v3225_v48 = vpack.c.bf16 %v2298_v6, %v2298_v6  ;;  %v2267_v15 = vld [vmem:[#allocation2 + $0xa2] sm:$0xff]  ;;  %v2268_v60 = vld [vmem:[#allocation2 + $0xaa] sm:$0xff]  ;;  %v5085_v47 = vadd.f32 %v4722_v16, %v2269_v36  ;;  %v2468_v31 = vmul.f32 %v4912_v51, %v2299_v29  ;;  %2610 = vst.msk [vmem:[%s4751_s29 + $0x48] sm:$0xf] %vm2591_vm4, %v3227_v40  ;;  %v2485_v32 = vpack.c.bf16 %v2464_v44, %v2294_v10 }
 0x1ea   : > { %2607 = vst.msk [vmem:[%s4751_s29 + $0x3c] sm:$0xf] %vm2591_vm4, %v3224_v33  ;;  %v2270_v5 = vld [vmem:[#allocation2 + $0xba] sm:$0xff]  ;;  %v2302_v62 = vadd.f32 %v4722_v16, %v2267_v15  ;;  %v2303_v58 = vadd.f32 %v4722_v16, %v2268_v60  ;;  %v2470_v61 = vmul.f32 %v4964_v13, %v2301_v43  ;;  %v2668_v23 = vadd.f32 %v2667_v2, %v2666_v49 }
 0x1eb   : > { %2608 = vst.msk [vmem:[%s4751_s29 + $0x40] sm:$0xf] %vm2591_vm4, %v3225_v48  ;;  %v2271_v30 = vld [vmem:[#allocation2 + $0xc2] sm:$0xff]  ;;  %v2272_v35 = vld [vmem:[#allocation2 + $0xca] sm:$0xff]  ;;  %v2273_v51 = vld [vmem:[#allocation2 + $0xd2] sm:$0xff]  ;;  %v2305_v12 = vadd.f32 %v4722_v16, %v2270_v5  ;;  %v3226_v1 = vpack.c.bf16 %v2468_v31, %v2468_v31  ;;  %v3231_v3 = vpack.c.bf16 %v5085_v47, %v5085_v47  ;;  %v2486_v28 = vpack.c.bf16 %v2466_v41, %v5016_v14 }
 0x1ec   : > { %v2274_v11 = vld [vmem:[#allocation2 + $0xda] sm:$0xff]  ;;  %v5101_v22 = vadd.f32 %v4722_v16, %v2271_v30  ;;  %v2307_v13 = vadd.f32 %v4722_v16, %v2272_v35  ;;  %v5105_v52 = vadd.f32 %v4722_v16, %v2273_v51  ;;  %v2472_v10 = vmul.f32 %v3172_v45, %v2303_v58 }
 0x1ed   : > { %v2309_v8 = vadd.f32 %v4722_v16, %v2274_v11  ;;  %v2474_v7 = vmul.f32 %v3173_v55, %v2305_v12  ;;  %v3228_v50 = vpack.c.bf16 %v2470_v61, %v2470_v61  ;;  %2609 = vst.msk [vmem:[%s4751_s29 + $0x44] sm:$0xf] %vm2591_vm4, %v3226_v1  ;;  %2614 = vst.msk [vmem:[%s4751_s29 + $0x58] sm:$0xf] %vm2591_vm4, %v3231_v3  ;;  %v2756_v4 = vsel %vm263_vm1, %v2720_v20, 0.0 }
 0x1ee   : > { %v5112_v0 = vmul.f32 %v3174_v59, %v2307_v13  ;;  %v3229_v25 = vpack.c.bf16 %v2302_v62, %v2302_v62  ;;  %v3230_v57 = vpack.c.bf16 %v2472_v10, %v2472_v10  ;;  %v3233_v24 = vpack.c.bf16 %v5101_v22, %v5101_v22 }
 0x1ef   : > { %v5116_v16 = vmul.f32 %v3175_v26, %v2309_v8  ;;  %v3232_v34 = vpack.c.bf16 %v2474_v7, %v2474_v7  ;;  %2611 = vst.msk [vmem:[%s4751_s29 + $0x4c] sm:$0xf] %vm2591_vm4, %v3228_v50  ;;  %v2632_v44 = vunpack.c.l.bf16 %v2485_v32  ;;  %v3235_v56 = vpack.c.bf16 %v5105_v52, %v5105_v52 }
 0x1f0   : > { %v3234_v14 = vpack.c.bf16 %v5112_v0, %v5112_v0  ;;  %2612 = vst.msk [vmem:[%s4751_s29 + $0x50] sm:$0xf] %vm2591_vm4, %v3229_v25  ;;  %2613 = vst.msk [vmem:[%s4751_s29 + $0x54] sm:$0xf] %vm2591_vm4, %v3230_v57  ;;  %v2669_v9 = vsel %vm263_vm1, %v5078_v53, 0.0  ;;  %v2757_v19 = vadd.f32 %v2756_v4, %v2755_v38  ;;  %v2633_v45 = vunpack.c.h.bf16 %v2485_v32 }
 0x1f1   : > { %v3236_v27 = vpack.c.bf16 %v5116_v16, %v5116_v16  ;;  %2615 = vst.msk [vmem:[%s4751_s29 + $0x5c] sm:$0xf] %vm2591_vm4, %v3232_v34  ;;  %2616 = vst.msk [vmem:[%s4751_s29 + $0x60] sm:$0xf] %vm2591_vm4, %v3233_v24  ;;  %v2670_v42 = vadd.f32 %v2669_v9, %v2668_v23  ;;  %v2487_v55 = vpack.c.bf16 %v2468_v31, %v2298_v6  ;;  %v2634_v17 = vunpack.c.l.bf16 %v2486_v28 }
 0x1f2   : > { %2617 = vst.msk [vmem:[%s4751_s29 + $0x64] sm:$0xf] %vm2591_vm4, %v3234_v14  ;;  %2618 = vst.msk [vmem:[%s4751_s29 + $0x68] sm:$0xf] %vm2591_vm4, %v3235_v56  ;;  %v2758_v63 = vsel %vm263_vm1, %v2721_v21, 0.0  ;;  %v2722_v59 = vmul.f32 %v5078_v53, %v5078_v53  ;;  %v2671_v18 = vsel %vm263_vm1, %v2632_v44, 0.0  ;;  %v2488_v20 = vpack.c.bf16 %v2470_v61, %v5064_v46 }
 0x1f3   : > { %2619 = vst.msk [vmem:[%s4751_s29 + $0x6c] sm:$0xf] %vm2591_vm4, %v3236_v27  ;;  %v2672_v41 = vadd.f32 %v2671_v18, %v2670_v42  ;;  %v2759_v54 = vadd.f32 %v2758_v63, %v2757_v19  ;;  %v2635_v37 = vunpack.c.h.bf16 %v2486_v28  ;;  %v2636_v26 = vunpack.c.l.bf16 %v2487_v55 }
 0x1f4   : > { %v2673_v49 = vsel %vm263_vm1, %v2633_v45, 0.0  ;;  %v2675_v38 = vsel %vm263_vm1, %v2634_v17, 0.0  ;;  %v2760_v29 = vsel %vm263_vm1, %v2722_v59, 0.0  ;;  %v2723_v39 = vmul.f32 %v2632_v44, %v2632_v44 }
 0x1f5   : > { %v2674_v6 = vadd.f32 %v2673_v49, %v2672_v41  ;;  %v2489_v33 = vpack.c.bf16 %v2472_v10, %v2302_v62  ;;  %v2761_v43 = vadd.f32 %v2760_v29, %v2759_v54  ;;  %v2637_v53 = vunpack.c.h.bf16 %v2487_v55 }
 0x1f6   : > { %v2638_v40 = vunpack.c.l.bf16 %v2488_v20  ;;  %v2677_v2 = vsel %vm263_vm1, %v2635_v37, 0.0  ;;  %v2679_v46 = vsel %vm263_vm1, %v2636_v26, 0.0  ;;  %v2724_v15 = vmul.f32 %v2633_v45, %v2633_v45 }
 0x1f7   : > { %v2676_v36 = vadd.f32 %v2675_v38, %v2674_v6  ;;  %v2725_v60 = vmul.f32 %v2634_v17, %v2634_v17  ;;  %v2490_v31 = vpack.c.bf16 %v2474_v7, %v5085_v47  ;;  %v2639_v21 = vunpack.c.h.bf16 %v2488_v20 }
 0x1f8   : > { %v2640_v5 = vunpack.c.l.bf16 %v2489_v33  ;;  %v2762_v61 = vsel %vm263_vm1, %v2723_v39, 0.0  ;;  %v2681_v62 = vsel %vm263_vm1, %v2637_v53, 0.0  ;;  %v2683_v32 = vsel %vm263_vm1, %v2638_v40, 0.0 }
 0x1f9   : > { %v2678_v48 = vadd.f32 %v2677_v2, %v2676_v36  ;;  %v2726_v30 = vmul.f32 %v2635_v37, %v2635_v37  ;;  %v2763_v35 = vadd.f32 %v2762_v61, %v2761_v43  ;;  %v2727_v12 = vmul.f32 %v2636_v26, %v2636_v26 }
 0x1fa   : > { %v2764_v1 = vsel %vm263_vm1, %v2724_v15, 0.0  ;;  %v2766_v3 = vsel %vm263_vm1, %v2725_v60, 0.0  ;;  %v2491_v47 = vpack.c.bf16 %v5112_v0, %v5101_v22  ;;  %v2641_v13 = vunpack.c.h.bf16 %v2489_v33 }
 0x1fb   : > { %v2680_v58 = vadd.f32 %v2679_v46, %v2678_v48  ;;  %v2765_v11 = vadd.f32 %v2764_v1, %v2763_v35  ;;  %v2642_v10 = vunpack.c.l.bf16 %v2490_v31  ;;  %v2685_v7 = vsel %vm263_vm1, %v2639_v21, 0.0 }
 0x1fc   : > { %v2687_v50 = vsel %vm263_vm1, %v2640_v5, 0.0  ;;  %v2728_v23 = vmul.f32 %v2637_v53, %v2637_v53  ;;  %v2729_v57 = vmul.f32 %v2638_v40, %v2638_v40  ;;  %v2768_v4 = vsel %vm263_vm1, %v2726_v30, 0.0 }
 0x1fd   : > { %v2682_v51 = vadd.f32 %v2681_v62, %v2680_v58  ;;  %v2767_v28 = vadd.f32 %v2766_v3, %v2765_v11  ;;  %v2770_v34 = vsel %vm263_vm1, %v2727_v12, 0.0  ;;  %v2643_v44 = vunpack.c.h.bf16 %v2490_v31 }
 0x1fe   : > { %v2644_v14 = vunpack.c.l.bf16 %v2491_v47  ;;  %v2689_v22 = vsel %vm263_vm1, %v2641_v13, 0.0  ;;  %v2691_v0 = vsel %vm263_vm1, %v2642_v10, 0.0  ;;  %v2730_v9 = vmul.f32 %v2639_v21, %v2639_v21 }
 0x1ff   : > { %v2684_v8 = vadd.f32 %v2683_v32, %v2682_v51  ;;  %v2769_v24 = vadd.f32 %v2768_v4, %v2767_v28  ;;  %v2731_v42 = vmul.f32 %v2640_v5, %v2640_v5  ;;  %v2772_v45 = vsel %vm263_vm1, %v2728_v23, 0.0 }
 0x200   : > { %v2774_v55 = vsel %vm263_vm1, %v2729_v57, 0.0  ;;  %v2492_v17 = vpack.c.bf16 %v5116_v16, %v5105_v52  ;;  %v2645_v59 = vunpack.c.h.bf16 %v2491_v47  ;;  %v2693_v20 = vsel %vm263_vm1, %v2643_v44, 0.0 }
 0x201   : > { %v2686_v25 = vadd.f32 %v2685_v7, %v2684_v8  ;;  %v2771_v19 = vadd.f32 %v2770_v34, %v2769_v24  ;;  %v2695_v41 = vsel %vm263_vm1, %v2644_v14, 0.0  ;;  %v2732_v54 = vmul.f32 %v2641_v13, %v2641_v13 }
 0x202   : > { %v2733_v49 = vmul.f32 %v2642_v10, %v2642_v10  ;;  %v2776_v38 = vsel %vm263_vm1, %v2730_v9, 0.0  ;;  %v2778_v6 = vsel %vm263_vm1, %v2731_v42, 0.0  ;;  %v2646_v29 = vunpack.c.l.bf16 %v2492_v17 }
 0x203   : > { %v2688_v56 = vadd.f32 %v2687_v50, %v2686_v25  ;;  %v2773_v63 = vadd.f32 %v2772_v45, %v2771_v19  ;;  %v2647_v36 = vunpack.c.h.bf16 %v2492_v17  ;;  %v2697_v52 = vsel %vm263_vm1, %v2645_v59, 0.0 }
 0x204   : > { %v2734_v16 = vmul.f32 %v2643_v44, %v2643_v44  ;;  %v2735_v40 = vmul.f32 %v2644_v14, %v2644_v14  ;;  %v2780_v2 = vsel %vm263_vm1, %v2732_v54, 0.0  ;;  %v2782_v46 = vsel %vm263_vm1, %v2733_v49, 0.0 }
 0x205   : > { %v2690_v27 = vadd.f32 %v2689_v22, %v2688_v56  ;;  %v2775_v37 = vadd.f32 %v2774_v55, %v2773_v63  ;;  %v2699_v48 = vsel %vm263_vm1, %v2646_v29, 0.0  ;;  %v2701_v31 = vsel %vm263_vm1, %v2647_v36, 0.0 }
 0x206   : > { %v2736_v58 = vmul.f32 %v2645_v59, %v2645_v59  ;;  %v2784_v61 = vsel %vm263_vm1, %v2734_v16, 0.0  ;;  %v2786_v62 = vsel %vm263_vm1, %v2735_v40, 0.0  ;;  %v2737_v35 = vmul.f32 %v2646_v29, %v2646_v29 }
 0x207   : > { %v2692_v18 = vadd.f32 %v2691_v0, %v2690_v27  ;;  %v2777_v39 = vadd.f32 %v2776_v38, %v2775_v37  ;;  %v2738_v1 = vmul.f32 %v2647_v36, %v2647_v36 }
 0x208   : > { %v2788_v3 = vsel %vm263_vm1, %v2736_v58, 0.0  ;;  %v2790_v13 = vsel %vm263_vm1, %v2737_v35, 0.0 }
 0x209   : > { %v2694_v26 = vadd.f32 %v2693_v20, %v2692_v18  ;;  %v2779_v43 = vadd.f32 %v2778_v6, %v2777_v39  ;;  %v2792_v7 = vsel %vm263_vm1, %v2738_v1, 0.0 }
 0x20b   : > { %v2696_v33 = vadd.f32 %v2695_v41, %v2694_v26  ;;  %v2781_v15 = vadd.f32 %v2780_v2, %v2779_v43 }
 0x20d   : > { %v2698_v53 = vadd.f32 %v2697_v52, %v2696_v33  ;;  %v2783_v21 = vadd.f32 %v2782_v46, %v2781_v15 }
 0x20f   : > { %v2700_v60 = vadd.f32 %v2699_v48, %v2698_v53  ;;  %v2785_v32 = vadd.f32 %v2784_v61, %v2783_v21 }
 0x211   : > { %v2702_v5 = vadd.f32 %v2701_v31, %v2700_v60  ;;  %v2787_v51 = vadd.f32 %v2786_v62, %v2785_v32 }
 0x213   : > { %v2703_v30 = vrot.slane %v2702_v5, 4  ;;  %v2789_v11 = vadd.f32 %v2788_v3, %v2787_v51 }
 0x215   : > { %v2704_v12 = vadd.f32 %v2703_v30, %v2702_v5  ;;  %v2791_v10 = vadd.f32 %v2790_v13, %v2789_v11 }
 0x217   : > { %v2705_v47 = vrot.slane %v2704_v12, 2  ;;  %v2793_v50 = vadd.f32 %v2792_v7, %v2791_v10 }
 0x219   : > { %v2706_v8 = vadd.f32 %v2705_v47, %v2704_v12  ;;  %v2794_v28 = vrot.slane %v2793_v50, 4 }
 0x21b   : > { %v2707_v23 = vrot.slane %v2706_v8, 1  ;;  %v2795_v57 = vadd.f32 %v2794_v28, %v2793_v50 }
 0x21d   : > { %v2708_v25 = vadd.f32 %v2707_v23, %v2706_v8  ;;  %v2796_v4 = vrot.slane %v2795_v57, 2 }
 0x21f   : > { %2710 = vst.msk [vmem:[%s241_s5] sm:$0x1] %vm2709_vm2, %v2708_v25  ;;  %v2797_v34 = vadd.f32 %v2796_v4, %v2795_v57 }
 0x221   : > { %v2798_v24 = vrot.slane %v2797_v34, 1 }
 0x223   : > { %v2799_v44 = vadd.f32 %v2798_v24, %v2797_v34 }
 0x225   : > { %2800 = vst.msk [vmem:[%s241_s5 + $0x1] sm:$0x1] %vm2709_vm2, %v2799_v44 }
 0x226   : > { %3777 = shalt.err (!%p3774_p5)
}
 0x227   : > { %s3778_s18 = scalar_lea.hbm %s2825_s11, 32  ;;  %s3782_s29 = scalar_lea.hbm %s5229_s4, 64 }
 0x228   : > { %p3779_p6 = scmp.ne.s32.totalorder %s2825_s11, %s3778_s18  ;;  %p3783_p10 = scmp.lt.s32.totalorder %s2825_s11, %s5229_s4 }
 0x229   : > { %p3784_p11 = scmp.lt.s32.totalorder %s3782_s29, %s3778_s18 }
 0x22a   : > { %p3780_p7 = pnand %p3779_p6, %p3909_p4 }
 0x22b   : > { %p3785_p12 = por %p3784_p11, %p3783_p10 }
 0x22c   : > { %p3781_p9 = pneg %p3780_p7 }
 0x22e   : > { %p3786_p13 = pnand %p3785_p12, %p3781_p9 }
 0x230   : > { %3789 = shalt.err (!%p3786_p13)
}
 0x231   : > { %3674 = dma.vmem_to_hbm [thread:$0]  (%p3909_p4), %s2828_s8, 32, %s2825_s11, %s2810_s12  }
 0x232 PF: > { %p3680_p0 = scmp.ge.s32.totalorder %s3840_s20, 2  ;;  %s2850_s5 = sand.u32 1, %s3820_s15  }
 0x233   : > { %s2851_s6 = scalar_lea.sflag [#allocation4], %s2850_s5 }
 0x234   : > { %p3677_p1 = pnand %p3680_p0, %p3916_p8 }
 0x236   : > { %p3678_p2 = pneg %p3677_p1 }
 0x238   : > { %3815 = dma.done.wait (%p3678_p2), %s2851_s6, 32  }
 0x239   : > { %3817 = vsyncadd (%p3678_p2), %s2851_s6, 4294967264  ;;  %s18_s20 = sadd.s32 1, %s3840_s20   ;;  %s5269_s15 = smov %s3824_s16 }
 0x23a   : > { %p15_p3 = scmp.ge.s32.totalorder %s18_s20, 4   ;;  %s5270_s16 = smov %s3828_s17 }
 0x23b   : > { %s5271_s17 = smov %s3922_s28  ;;  %s5272_s18 = smov %s3836_s19 }
 0x23c   : > { %s5273_s19 = smov %s5275_s23  ;;  %17 = sbr.rel (!%p15_p3) target bundleno = 4 (0x4), region = 93 }
 0x241   :  { %2856 = vsyncpa [#allocation4], 1 }
 0x242   :  { %2858 = vsyncpa [#allocation4 + $0x1], 1 }

</bundles_post_ra>
